<compile_context>
chip_gen: v7x
topology: tpu7x:2x2x1
jax: 0.10.0
libtpu: 0.0.40
codegen_flags: <defaults>
</compile_context>

<pallas_src>
import functools

import jax
import jax.numpy as jnp
from jax.experimental import pallas as pl
from jax.experimental.pallas import tpu as pltpu


def _scatter_cols(cols, width):
    """Place [rows, 1] columns into lanes 0..len(cols)-1 of a [rows, width] slab.

    VPU-only iota-compare + select; the final output store is then a single
    lane-dense vst (no per-step masked stores, no in-kernel concatenates).
    """
    rows = cols[0].shape[0]
    lane = jax.lax.broadcasted_iota(jnp.int32, (rows, width), 1)
    out = jnp.zeros((rows, width), jnp.float32)
    for idx, col in enumerate(cols):
        out = jnp.where(lane == idx, col, out)
    return out


def _seq2seq_kernel(seqs_ref, mask_ref,
                    wih_e_ref, be_i_ref, whh_e_ref, be_hn_ref,
                    wa_ref, ba_ref, va_ref,
                    wd_i_ref, bd_i_ref, whh_d_ref, bd_hn_ref,
                    wo_ref, bo_ref,
                    preds_ref, e_ref, att_ref,
                    *, input_proj_on_vpu):
    f32 = jnp.float32
    Bb, T = mask_ref.shape          # batch block, sequence length
    H = wa_ref.shape[0]             # rnn_dim
    H3 = 3 * H
    W = preds_ref.shape[1]          # wk_ahead
    NEG = jnp.float32(-1e30)

    # ------------- encoder: hoisted, gate-packed input projection -------------
    x_all = seqs_ref[...]                               # [T*Bb, S], time-major rows
    be_i = be_i_ref[...]                                # [1, 3H]; r/z carry b_ih+b_hh, n carries b_in
    if input_proj_on_vpu:
        # S is tiny: S broadcast FMAs on the VPU beat an MXU GEMM whose
        # contraction depth / lanes would be almost entirely padding.
        wih = wih_e_ref[...]                            # [S, 3H] f32
        S = wih.shape[0]
        gi_all = x_all[:, 0:1] * wih[0:1, :]
        for s in range(1, S):
            gi_all = gi_all + x_all[:, s:s + 1] * wih[s:s + 1, :]
        gi_all = gi_all + be_i                          # [T*Bb, 3H]
    else:
        gi_all = jnp.dot(x_all.astype(wih_e_ref.dtype), wih_e_ref[...],
                         preferred_element_type=f32) + be_i

    whh_e = whh_e_ref[...]                              # [H, 3H]  (matmul dtype)
    mm_dtype = whh_e.dtype
    be_hn = be_hn_ref[...]                              # [1, H]
    wa = wa_ref[...]                                    # [H, H]   (matmul dtype)
    ba = ba_ref[...]                                    # [1, H]
    va = va_ref[...]                                    # [1, H]
    mask = mask_ref[...]                                # [Bb, T]

    # -------- encoder GRU + fused attention (online masked softmax) --------
    h = jnp.zeros((Bb, H), f32)
    m_run = jnp.full((Bb, 1), NEG, f32)                 # running max of masked scores
    l_run = jnp.zeros((Bb, 1), f32)                     # running softmax denominator
    ctx = jnp.zeros((Bb, H), f32)                       # running softmax numerator
    e_cols = []
    # Fully unrolled recurrence (T static & small).  The only MXU work on the
    # serial h_t -> h_{t+1} chain is ONE packed [Bb,H]@[H,3H] matmul; the
    # attention branch is off the chain and overlaps the next step.
    # TODO(synk): for T beyond ~64, switch to lax.fori_loop(unroll=4-8)
    # carrying (h, m, l, ctx) and writing e_t into a small VMEM scratch.
    for t in range(T):
        lo = t * Bb
        gi_t = gi_all[lo:lo + Bb, :]                    # [Bb, 3H]
        gh = jnp.dot(h.astype(mm_dtype), whh_e,
                     preferred_element_type=f32)        # [Bb, 3H]
        pre = gi_t + gh
        r = jax.nn.sigmoid(pre[:, 0:H])
        z = jax.nn.sigmoid(pre[:, H:2 * H])
        n = jnp.tanh(gi_t[:, 2 * H:H3] + r * (gh[:, 2 * H:H3] + be_hn))
        h = (1.0 - z) * n + z * h

        # Bahdanau score e_t = v . tanh(W h_t + b)  (head = VPU mul + lane reduce)
        proj = jnp.tanh(jnp.dot(h.astype(mm_dtype), wa,
                                preferred_element_type=f32) + ba)
        e_t = jnp.sum(proj * va, axis=-1, keepdims=True)      # [Bb, 1]
        e_cols.append(e_t)

        # Online masked-softmax accumulation of the context vector: only the
        # (m, l, ctx) carries stay live — never T hidden states.
        mask_t = mask[:, t:t + 1]
        e_m = jnp.where(mask_t > 0.0, e_t, NEG)
        m_new = jnp.maximum(m_run, e_m)
        scale = jnp.exp(m_run - m_new)
        p = jnp.exp(e_m - m_new) * mask_t
        l_run = scale * l_run + p
        ctx = scale * ctx + p * h
        m_run = m_new

    # Raw (unmasked) scores: batch-first, lane-dense, single store.
    e_bt = _scatter_cols(e_cols, T)                     # [Bb, T]
    e_ref[...] = e_bt

    # Attention-weight output: exact normalization (tiny [Bb, T] VPU work);
    # fully masked rows get all-zero weights (matches the reference).
    e_msk = jnp.where(mask > 0.0, e_bt, jnp.full_like(e_bt, NEG))
    e_max = jnp.max(e_msk, axis=-1, keepdims=True)
    ex = jnp.exp(e_msk - e_max) * mask
    denom = jnp.sum(ex, axis=-1, keepdims=True)
    att_ref[...] = ex / jnp.maximum(denom, 1e-20)

    # Context vector from the online accumulators (approx EUP reciprocal only
    # feeds the decoder state, not the normalized attention output).
    c = ctx * pl.reciprocal(jnp.maximum(l_run, 1e-20), approx=True)

    # ------------------------- decoder GRU -------------------------
    wd_i = wd_i_ref[...]                                # [1, 3H]  (input dim is 1)
    bd_i = bd_i_ref[...]                                # [1, 3H]
    whh_d = whh_d_ref[...]                              # [H, 3H]  (matmul dtype)
    bd_hn = bd_hn_ref[...]                              # [1, H]
    wo = wo_ref[...]                                    # [1, H]
    bo = bo_ref[...]                                    # [1, 1]

    h = c                                               # context vector seeds h0
    y = jnp.zeros((Bb, 1), f32)
    y_cols = []
    for _ in range(W):
        # Input projection (input dim 1): VPU broadcast multiply, no MXU
        # fill/drain per autoregressive step.
        gi = y * wd_i + bd_i                            # [Bb, 3H]
        gh = jnp.dot(h.astype(mm_dtype), whh_d,
                     preferred_element_type=f32)        # [Bb, 3H]
        pre = gi + gh
        r = jax.nn.sigmoid(pre[:, 0:H])
        z = jax.nn.sigmoid(pre[:, H:2 * H])
        n = jnp.tanh(gi[:, 2 * H:H3] + r * (gh[:, 2 * H:H3] + bd_hn))
        h = (1.0 - z) * n + z * h
        # Output head Linear(H -> 1): VPU multiply + lane reduce.
        y = jnp.sum(h * wo, axis=-1, keepdims=True) + bo
        y_cols.append(y)

    # Single lane-dense, batch-first store of all predictions.
    preds_ref[...] = _scatter_cols(y_cols, W)


# --------------------------------------------------------------------------
# parameter handling
# --------------------------------------------------------------------------
def init_params(key, n_signals, rnn_dim):
    """Deterministic PyTorch-layout params (U(-1/sqrt(H), 1/sqrt(H)))."""
    H = rnn_dim
    k = 1.0 / jnp.sqrt(jnp.float32(H))
    keys = jax.random.split(key, 13)

    def u(kk, shape):
        return jax.random.uniform(kk, shape, jnp.float32, minval=-k, maxval=k)

    return dict(
        # encoder GRU (nn.GRU layout: [3H, in]/[3H, H], gate order r, z, n)
        enc_w_ih=u(keys[0], (3 * H, n_signals)),
        enc_w_hh=u(keys[1], (3 * H, H)),
        enc_b_ih=u(keys[2], (3 * H,)),
        enc_b_hh=u(keys[3], (3 * H,)),
        # additive attention
        attn_w=u(keys[4], (H, H)),
        attn_b=u(keys[5], (H,)),
        attn_v=u(keys[6], (H,)),
        # decoder GRU (input dim = 1)
        dec_w_ih=u(keys[7], (3 * H, 1)),
        dec_w_hh=u(keys[8], (3 * H, H)),
        dec_b_ih=u(keys[9], (3 * H,)),
        dec_b_hh=u(keys[10], (3 * H,)),
        # output head Linear(H -> 1)
        out_w=u(keys[11], (1, H)),
        out_b=u(keys[12], (1,)),
    )


def _pack_gru(w_ih, w_hh, b_ih, b_hh, H):
    """PyTorch GRU params -> gate-packed right-multiply operands (order r,z,n).

    Returns:
      w_i  [in, 3H] input-side weights, gates contiguous along lanes
      w_h  [H, 3H]  recurrent weights, gates contiguous along lanes
      b_i  [1, 3H]  r/z columns carry b_ih+b_hh; n column carries b_in only
      b_hn [1, H]   recurrent n bias (must stay inside the r * (...) term)
    """
    w_i = jnp.transpose(w_ih).astype(jnp.float32)
    w_h = jnp.transpose(w_hh).astype(jnp.float32)
    b_i = (b_ih + jnp.concatenate([b_hh[:2 * H], jnp.zeros((H,), b_hh.dtype)])
           ).reshape(1, 3 * H).astype(jnp.float32)
    b_hn = b_hh[2 * H:].reshape(1, H).astype(jnp.float32)
    return w_i, w_h, b_i, b_hn


def _pick_batch_block(B):
    """Largest MXU-friendly batch block dividing B; prefer an even block count
    so dimension_semantics=("parallel",) shards across both v7x TensorCores."""
    candidates = [c for c in (256, 128, 64, 32, 16, 8) if B % c == 0]
    if not candidates:
        # TODO(synk): for ragged tiny batches, pad B so the block count is even
        # and v7x's second TensorCore is used; at this scale it is latency noise.
        return B, 1
    bb = candidates[0]
    nb = B // bb
    if nb % 2 == 1:
        for c in candidates:
            if (B // c) % 2 == 0 and 2 * c >= bb:   # accept at most a halving
                bb, nb = c, B // c
                break
    return bb, nb


def _vmem_limit_bytes(Bb, T, S, H, W, mm_itemsize):
    """Scoped-VMEM budget from actual block/weight sizes (double-buffered)."""
    f32, dbl = 4, 2
    io = dbl * f32 * (T * Bb * S + Bb * T + Bb * W + 2 * Bb * T)
    weights = dbl * (S * 3 * H * f32 + 2 * H * 3 * H * mm_itemsize
                     + H * H * mm_itemsize + 14 * H * f32 + 16)
    live = f32 * (T * Bb * 3 * H + 16 * Bb * H + 4 * Bb * T)
    est = 2 * (io + weights + live)            # 2x headroom for compiler temps
    return int(min(64 * 1024 * 1024, max(16 * 1024 * 1024, est)))


@functools.partial(jax.jit, static_argnames=("wk_ahead", "get_att", "matmul_dtype"))
def input_encoder_v2_decoder(seqs, mask_seq, params, wk_ahead, get_att=False,
                             matmul_dtype=jnp.bfloat16):
    """Forward pass of InputEncoderv2Decoder.

    seqs:     [B, T, n_signals] float32 (batch_first, like PyTorch)
    mask_seq: [B, T] float32 (1 = valid, 0 = padded)
    matmul_dtype: operand dtype for the recurrent/attention MXU matmuls
                  (accumulation is always f32); bf16 is the native MXU rate.
    returns predictions [B, wk_ahead]  (plus e / attention values if get_att)
    """
    B, T, S = seqs.shape
    H = params["attn_w"].shape[0]
    W = int(wk_ahead)
    mm_dtype = jnp.dtype(matmul_dtype)
    input_proj_on_vpu = S <= 8          # tiny feature dim: VPU FMAs, no MXU fill

    Bb, nb = _pick_batch_block(B)

    # Time-major rows grouped per batch block: seqs_g[blk, t*Bb + j, :] =
    # seqs[blk*Bb + j, t, :]  -> the hoisted input projection sees a clean
    # [T*Bb, S] operand with no in-kernel reshape.
    seqs_g = jnp.transpose(
        seqs.astype(jnp.float32).reshape(nb, Bb, T, S),
        (0, 2, 1, 3)).reshape(nb, T * Bb, S)
    mask_bt = mask_seq.astype(jnp.float32)               # [B, T], batch-first

    e_wi, e_wh, e_bi, e_bhn = _pack_gru(params["enc_w_ih"], params["enc_w_hh"],
                                        params["enc_b_ih"], params["enc_b_hh"], H)
    d_wi, d_wh, d_bi, d_bhn = _pack_gru(params["dec_w_ih"], params["dec_w_hh"],
                                        params["dec_b_ih"], params["dec_b_hh"], H)
    # MXU operands in matmul_dtype; everything elementwise stays f32.
    e_wh = e_wh.astype(mm_dtype)
    d_wh = d_wh.astype(mm_dtype)
    wa = jnp.transpose(params["attn_w"]).astype(mm_dtype)
    if not input_proj_on_vpu:
        e_wi = e_wi.astype(mm_dtype)
    ba = params["attn_b"].reshape(1, H).astype(jnp.float32)
    va = params["attn_v"].reshape(1, H).astype(jnp.float32)
    wo = params["out_w"].reshape(1, H).astype(jnp.float32)
    bo = params["out_b"].reshape(1, 1).astype(jnp.float32)

    weight_inputs = (e_wi, e_bi, e_wh, e_bhn, wa, ba, va,
                     d_wi, d_bi, d_wh, d_bhn, wo, bo)

    def _replicated_spec(arr):
        # Constant block index -> the pipeliner does not re-DMA across steps.
        # TODO(synk): pipeline_mode=pl.Buffered(1) would also drop the second
        # (unused) weight buffer — a VMEM lever on v7x (64 MiB physical).
        zeros = (0,) * arr.ndim
        return pl.BlockSpec(arr.shape, lambda i, _z=zeros: _z)

    in_specs = ([pl.BlockSpec((None, T * Bb, S), lambda i: (i, 0, 0)),
                 pl.BlockSpec((Bb, T), lambda i: (i, 0))]
                + [_replicated_spec(a) for a in weight_inputs])
    out_specs = (pl.BlockSpec((Bb, W), lambda i: (i, 0)),
                 pl.BlockSpec((Bb, T), lambda i: (i, 0)),
                 pl.BlockSpec((Bb, T), lambda i: (i, 0)))

    kernel = functools.partial(_seq2seq_kernel,
                               input_proj_on_vpu=input_proj_on_vpu)

    preds, e_vals, att_vals = pl.pallas_call(
        kernel,
        grid=(nb,),
        out_shape=(
            jax.ShapeDtypeStruct((B, W), jnp.float32),   # predictions [B, W]
            jax.ShapeDtypeStruct((B, T), jnp.float32),   # raw scores  [B, T]
            jax.ShapeDtypeStruct((B, T), jnp.float32),   # attention   [B, T]
        ),
        in_specs=in_specs,
        out_specs=out_specs,
        compiler_params=pltpu.CompilerParams(
            dimension_semantics=("parallel",),
            vmem_limit_bytes=_vmem_limit_bytes(Bb, T, S, H, W, mm_dtype.itemsize)),
    )(seqs_g, mask_bt, *weight_inputs)

    if get_att:
        return preds, e_vals, att_vals
    return preds


# --------------------------------------------------------------------------
# pure-JAX reference (same reconstructed semantics) for a correctness check
# --------------------------------------------------------------------------
def _reference(seqs, mask_seq, params, wk_ahead):
    B, T, _ = seqs.shape
    H = params["attn_w"].shape[0]

    def gru_cell(x, h, w_ih, w_hh, b_ih, b_hh):
        gi = x @ w_ih.T + b_ih
        gh = h @ w_hh.T + b_hh
        i_r, i_z, i_n = jnp.split(gi, 3, axis=-1)
        h_r, h_z, h_n = jnp.split(gh, 3, axis=-1)
        r = jax.nn.sigmoid(i_r + h_r)
        z = jax.nn.sigmoid(i_z + h_z)
        n = jnp.tanh(i_n + r * h_n)
        return (1.0 - z) * n + z * h

    h = jnp.zeros((B, H), jnp.float32)
    hs, es = [], []
    for t in range(T):
        h = gru_cell(seqs[:, t, :], h, params["enc_w_ih"], params["enc_w_hh"],
                     params["enc_b_ih"], params["enc_b_hh"])
        hs.append(h)
        proj = jnp.tanh(h @ params["attn_w"].T + params["attn_b"])
        es.append(proj @ params["attn_v"])
    e = jnp.stack(es, axis=1)                                    # [B, T]
    e_m = jnp.where(mask_seq > 0, e, -1e30)
    ex = jnp.exp(e_m - e_m.max(-1, keepdims=True)) * mask_seq
    alpha = ex / jnp.maximum(ex.sum(-1, keepdims=True), 1e-20)
    c = sum(alpha[:, t:t + 1] * hs[t] for t in range(T))

    h = c
    y = jnp.zeros((B, 1), jnp.float32)
    preds = []
    for _ in range(wk_ahead):
        h = gru_cell(y, h, params["dec_w_ih"], params["dec_w_hh"],
                     params["dec_b_ih"], params["dec_b_hh"])
        y = h @ params["out_w"].T + params["out_b"]
        preds.append(y)
    return jnp.concatenate(preds, axis=1), e, alpha


if __name__ == "__main__":
    # Small shapes consistent with the module's constructor arguments.
    batch = 2
    size_seq = 8       # T
    n_signals = 4      # input feature dim per timestep
    rnn_dim = 32       # GRU hidden size
    wk_ahead = 4       # decoder horizon

    key = jax.random.PRNGKey(0)
    k_seq, k_par = jax.random.split(key)

    seqs = jax.random.normal(k_seq, (batch, size_seq, n_signals), jnp.float32)
    mask_seq = jnp.ones((batch, size_seq), jnp.float32)
    mask_seq = mask_seq.at[1, 6:].set(0.0)   # exercise masking on one sequence

    params = init_params(k_par, n_signals, rnn_dim)
    ref_preds, ref_e, ref_att = _reference(seqs, mask_seq, params, wk_ahead)

    # ---- f32-operand run: tight check of the kernel math ----
    p32, e32, a32 = input_encoder_v2_decoder(
        seqs, mask_seq, params, wk_ahead, get_att=True,
        matmul_dtype=jnp.float32)
    jax.block_until_ready((p32, e32, a32))
    assert p32.shape == (batch, wk_ahead)
    assert e32.shape == (batch, size_seq)
    assert a32.shape == (batch, size_seq)
    assert bool(jnp.all(jnp.isfinite(p32)))
    assert float(jnp.max(jnp.abs(a32[1, 6:]))) == 0.0   # masked -> zero attention
    assert bool(jnp.allclose(e32, ref_e, atol=2e-2, rtol=2e-2))
    assert bool(jnp.allclose(a32, ref_att, atol=2e-2, rtol=2e-2))
    assert bool(jnp.allclose(p32, ref_preds, atol=2e-2, rtol=2e-2))

    # ---- default bf16-operand / f32-accumulate run (native MXU rate on
    # v5e/v6e/v7x); validate recurrence drift against the f32 reference ----
    preds, e_vals, att_vals = input_encoder_v2_decoder(
        seqs, mask_seq, params, wk_ahead, get_att=True)
    jax.block_until_ready((preds, e_vals, att_vals))
    assert bool(jnp.all(jnp.isfinite(preds)))
    assert float(jnp.max(jnp.abs(att_vals[1, 6:]))) == 0.0
    assert bool(jnp.allclose(e_vals, ref_e, atol=5e-2, rtol=5e-2))
    assert bool(jnp.allclose(att_vals, ref_att, atol=5e-2, rtol=5e-2))
    assert bool(jnp.allclose(preds, ref_preds, atol=5e-2, rtol=5e-2))

    print("KERNEL_OK")
</pallas_src>

<mosaic_0001>
module attributes {stable_mosaic.version = 11 : i64} {
  func.func @_seq2seq_kernel(%arg0: i32, %arg1: memref<1x16x4xf32, #tpu.memory_space<vmem>>, %arg2: memref<2x8xf32, #tpu.memory_space<vmem>>, %arg3: memref<4x96xf32, #tpu.memory_space<vmem>>, %arg4: memref<1x96xf32, #tpu.memory_space<vmem>>, %arg5: memref<32x96xf32, #tpu.memory_space<vmem>>, %arg6: memref<1x32xf32, #tpu.memory_space<vmem>>, %arg7: memref<32x32xf32, #tpu.memory_space<vmem>>, %arg8: memref<1x32xf32, #tpu.memory_space<vmem>>, %arg9: memref<1x32xf32, #tpu.memory_space<vmem>>, %arg10: memref<1x96xf32, #tpu.memory_space<vmem>>, %arg11: memref<1x96xf32, #tpu.memory_space<vmem>>, %arg12: memref<32x96xf32, #tpu.memory_space<vmem>>, %arg13: memref<1x32xf32, #tpu.memory_space<vmem>>, %arg14: memref<1x32xf32, #tpu.memory_space<vmem>>, %arg15: memref<1x1xf32, #tpu.memory_space<vmem>>, %arg16: memref<2x4xf32, #tpu.memory_space<vmem>>, %arg17: memref<2x8xf32, #tpu.memory_space<vmem>>, %arg18: memref<2x8xf32, #tpu.memory_space<vmem>>) attributes {dimension_semantics = [#tpu.dimension_semantics<parallel>], iteration_bounds = array<i64: 1>, scalar_prefetch = 0 : i64, scratch_operands = 0 : i64, tpu.core_type = #tpu.core_type<tc>, window_params = [{transform_indices = @transform_0, window_bounds = array<i64: 1, 16, 4>}, {transform_indices = @transform_1, window_bounds = array<i64: 2, 8>}, {pipeline_mode = #tpu.pipeline_mode<synchronous>, transform_indices = @transform_2, window_bounds = array<i64: 4, 96>}, {pipeline_mode = #tpu.pipeline_mode<synchronous>, transform_indices = @transform_3, window_bounds = array<i64: 1, 96>}, {pipeline_mode = #tpu.pipeline_mode<synchronous>, transform_indices = @transform_4, window_bounds = array<i64: 32, 96>}, {pipeline_mode = #tpu.pipeline_mode<synchronous>, transform_indices = @transform_5, window_bounds = array<i64: 1, 32>}, {pipeline_mode = #tpu.pipeline_mode<synchronous>, transform_indices = @transform_6, window_bounds = array<i64: 32, 32>}, {pipeline_mode = #tpu.pipeline_mode<synchronous>, transform_indices = @transform_7, window_bounds = array<i64: 1, 32>}, {pipeline_mode = #tpu.pipeline_mode<synchronous>, transform_indices = @transform_8, window_bounds = array<i64: 1, 32>}, {pipeline_mode = #tpu.pipeline_mode<synchronous>, transform_indices = @transform_9, window_bounds = array<i64: 1, 96>}, {pipeline_mode = #tpu.pipeline_mode<synchronous>, transform_indices = @transform_10, window_bounds = array<i64: 1, 96>}, {pipeline_mode = #tpu.pipeline_mode<synchronous>, transform_indices = @transform_11, window_bounds = array<i64: 32, 96>}, {pipeline_mode = #tpu.pipeline_mode<synchronous>, transform_indices = @transform_12, window_bounds = array<i64: 1, 32>}, {pipeline_mode = #tpu.pipeline_mode<synchronous>, transform_indices = @transform_13, window_bounds = array<i64: 1, 32>}, {pipeline_mode = #tpu.pipeline_mode<synchronous>, transform_indices = @transform_14, window_bounds = array<i64: 1, 1>}, {transform_indices = @transform_15, window_bounds = array<i64: 2, 4>}, {transform_indices = @transform_16, window_bounds = array<i64: 2, 8>}, {transform_indices = @transform_17, window_bounds = array<i64: 2, 8>}]} {
    %c0 = arith.constant 0 : index
    %c0_0 = arith.constant 0 : index
    %c0_1 = arith.constant 0 : index
    %0 = vector.load %arg1[%c0, %c0_0, %c0_1] : memref<1x16x4xf32, #tpu.memory_space<vmem>>, vector<1x16x4xf32>
    %1 = vector.shape_cast %0 : vector<1x16x4xf32> to vector<16x4xf32>
    %c0_2 = arith.constant 0 : index
    %c0_3 = arith.constant 0 : index
    %2 = vector.load %arg4[%c0_2, %c0_3] : memref<1x96xf32, #tpu.memory_space<vmem>>, vector<1x96xf32>
    %c0_4 = arith.constant 0 : index
    %c0_5 = arith.constant 0 : index
    %3 = vector.load %arg3[%c0_4, %c0_5] : memref<4x96xf32, #tpu.memory_space<vmem>>, vector<4x96xf32>
    %4 = vector.extract_strided_slice %1 {offsets = [0, 0], sizes = [16, 1], strides = [1, 1]} : vector<16x4xf32> to vector<16x1xf32>
    %5 = vector.extract_strided_slice %3 {offsets = [0, 0], sizes = [1, 96], strides = [1, 1]} : vector<4x96xf32> to vector<1x96xf32>
    %6 = vector.broadcast %4 : vector<16x1xf32> to vector<16x96xf32>
    %7 = vector.broadcast %5 : vector<1x96xf32> to vector<16x96xf32>
    %8 = arith.mulf %6, %7 : vector<16x96xf32>
    %9 = vector.extract_strided_slice %1 {offsets = [0, 1], sizes = [16, 1], strides = [1, 1]} : vector<16x4xf32> to vector<16x1xf32>
    %10 = vector.extract_strided_slice %3 {offsets = [1, 0], sizes = [1, 96], strides = [1, 1]} : vector<4x96xf32> to vector<1x96xf32>
    %11 = vector.broadcast %9 : vector<16x1xf32> to vector<16x96xf32>
    %12 = vector.broadcast %10 : vector<1x96xf32> to vector<16x96xf32>
    %13 = arith.mulf %11, %12 : vector<16x96xf32>
    %14 = arith.addf %8, %13 : vector<16x96xf32>
    %15 = vector.extract_strided_slice %1 {offsets = [0, 2], sizes = [16, 1], strides = [1, 1]} : vector<16x4xf32> to vector<16x1xf32>
    %16 = vector.extract_strided_slice %3 {offsets = [2, 0], sizes = [1, 96], strides = [1, 1]} : vector<4x96xf32> to vector<1x96xf32>
    %17 = vector.broadcast %15 : vector<16x1xf32> to vector<16x96xf32>
    %18 = vector.broadcast %16 : vector<1x96xf32> to vector<16x96xf32>
    %19 = arith.mulf %17, %18 : vector<16x96xf32>
    %20 = arith.addf %14, %19 : vector<16x96xf32>
    %21 = vector.extract_strided_slice %1 {offsets = [0, 3], sizes = [16, 1], strides = [1, 1]} : vector<16x4xf32> to vector<16x1xf32>
    %22 = vector.extract_strided_slice %3 {offsets = [3, 0], sizes = [1, 96], strides = [1, 1]} : vector<4x96xf32> to vector<1x96xf32>
    %23 = vector.broadcast %21 : vector<16x1xf32> to vector<16x96xf32>
    %24 = vector.broadcast %22 : vector<1x96xf32> to vector<16x96xf32>
    %25 = arith.mulf %23, %24 : vector<16x96xf32>
    %26 = arith.addf %20, %25 : vector<16x96xf32>
    %27 = vector.broadcast %2 : vector<1x96xf32> to vector<16x96xf32>
    %28 = arith.addf %26, %27 : vector<16x96xf32>
    %c0_6 = arith.constant 0 : index
    %c0_7 = arith.constant 0 : index
    %29 = vector.load %arg5[%c0_6, %c0_7] : memref<32x96xf32, #tpu.memory_space<vmem>>, vector<32x96xf32>
    %c0_8 = arith.constant 0 : index
    %c0_9 = arith.constant 0 : index
    %30 = vector.load %arg6[%c0_8, %c0_9] : memref<1x32xf32, #tpu.memory_space<vmem>>, vector<1x32xf32>
    %c0_10 = arith.constant 0 : index
    %c0_11 = arith.constant 0 : index
    %31 = vector.load %arg7[%c0_10, %c0_11] : memref<32x32xf32, #tpu.memory_space<vmem>>, vector<32x32xf32>
    %c0_12 = arith.constant 0 : index
    %c0_13 = arith.constant 0 : index
    %32 = vector.load %arg8[%c0_12, %c0_13] : memref<1x32xf32, #tpu.memory_space<vmem>>, vector<1x32xf32>
    %c0_14 = arith.constant 0 : index
    %c0_15 = arith.constant 0 : index
    %33 = vector.load %arg9[%c0_14, %c0_15] : memref<1x32xf32, #tpu.memory_space<vmem>>, vector<1x32xf32>
    %c0_16 = arith.constant 0 : index
    %c0_17 = arith.constant 0 : index
    %34 = vector.load %arg2[%c0_16, %c0_17] : memref<2x8xf32, #tpu.memory_space<vmem>>, vector<2x8xf32>
    %cst = arith.constant 0.000000e+00 : f32
    %35 = vector.broadcast %cst : f32 to vector<2x32xf32>
    %cst_18 = arith.constant -1.000000e+30 : f32
    %36 = vector.broadcast %cst_18 : f32 to vector<2x1xf32>
    %cst_19 = arith.constant 0.000000e+00 : f32
    %37 = vector.broadcast %cst_19 : f32 to vector<2x1xf32>
    %cst_20 = arith.constant 0.000000e+00 : f32
    %38 = vector.broadcast %cst_20 : f32 to vector<2x32xf32>
    %39 = vector.extract_strided_slice %28 {offsets = [0, 0], sizes = [2, 96], strides = [1, 1]} : vector<16x96xf32> to vector<2x96xf32>
    %cst_21 = arith.constant dense<0.000000e+00> : vector<2x96xf32>
    %40 = tpu.matmul %35, %29, %cst_21 {dimension_numbers = #tpu.dot_dimension_numbers<[1], [0], [0], [1], [0, 0, 1, 1], [], []>} : vector<2x32xf32>, vector<32x96xf32>, vector<2x96xf32> -> vector<2x96xf32>
    %41 = arith.addf %39, %40 : vector<2x96xf32>
    %42 = vector.extract_strided_slice %41 {offsets = [0, 0], sizes = [2, 32], strides = [1, 1]} : vector<2x96xf32> to vector<2x32xf32>
    %43 = arith.negf %42 : vector<2x32xf32>
    %44 = math.exp %43 : vector<2x32xf32>
    %cst_22 = arith.constant 1.000000e+00 : f32
    %45 = vector.broadcast %cst_22 : f32 to vector<2x32xf32>
    %46 = arith.addf %45, %44 : vector<2x32xf32>
    %47 = arith.divf %45, %46 : vector<2x32xf32>
    %48 = vector.extract_strided_slice %41 {offsets = [0, 32], sizes = [2, 32], strides = [1, 1]} : vector<2x96xf32> to vector<2x32xf32>
    %49 = arith.negf %48 : vector<2x32xf32>
    %50 = math.exp %49 : vector<2x32xf32>
    %cst_23 = arith.constant 1.000000e+00 : f32
    %51 = vector.broadcast %cst_23 : f32 to vector<2x32xf32>
    %52 = arith.addf %51, %50 : vector<2x32xf32>
    %53 = arith.divf %51, %52 : vector<2x32xf32>
    %54 = vector.extract_strided_slice %39 {offsets = [0, 64], sizes = [2, 32], strides = [1, 1]} : vector<2x96xf32> to vector<2x32xf32>
    %55 = vector.extract_strided_slice %40 {offsets = [0, 64], sizes = [2, 32], strides = [1, 1]} : vector<2x96xf32> to vector<2x32xf32>
    %56 = vector.broadcast %30 : vector<1x32xf32> to vector<2x32xf32>
    %57 = arith.addf %55, %56 : vector<2x32xf32>
    %58 = arith.mulf %47, %57 : vector<2x32xf32>
    %59 = arith.addf %54, %58 : vector<2x32xf32>
    %60 = math.tanh %59 : vector<2x32xf32>
    %cst_24 = arith.constant 1.000000e+00 : f32
    %61 = vector.broadcast %cst_24 : f32 to vector<2x32xf32>
    %62 = arith.subf %61, %53 : vector<2x32xf32>
    %63 = arith.mulf %62, %60 : vector<2x32xf32>
    %64 = arith.mulf %53, %35 : vector<2x32xf32>
    %65 = arith.addf %63, %64 : vector<2x32xf32>
    %cst_25 = arith.constant dense<0.000000e+00> : vector<2x32xf32>
    %66 = tpu.matmul %65, %31, %cst_25 {dimension_numbers = #tpu.dot_dimension_numbers<[1], [0], [0], [1], [0, 0, 1, 1], [], []>} : vector<2x32xf32>, vector<32x32xf32>, vector<2x32xf32> -> vector<2x32xf32>
    %67 = vector.broadcast %32 : vector<1x32xf32> to vector<2x32xf32>
    %68 = arith.addf %66, %67 : vector<2x32xf32>
    %69 = math.tanh %68 : vector<2x32xf32>
    %70 = vector.broadcast %33 : vector<1x32xf32> to vector<2x32xf32>
    %71 = arith.mulf %69, %70 : vector<2x32xf32>
    %cst_26 = arith.constant dense<0.000000e+00> : vector<2xf32>
    %72 = vector.multi_reduction <add>, %71, %cst_26 [1] : vector<2x32xf32> to vector<2xf32>
    %73 = vector.shape_cast %72 : vector<2xf32> to vector<2x1xf32>
    %74 = vector.extract_strided_slice %34 {offsets = [0, 0], sizes = [2, 1], strides = [1, 1]} : vector<2x8xf32> to vector<2x1xf32>
    %cst_27 = arith.constant 0.000000e+00 : f32
    %75 = vector.broadcast %cst_27 : f32 to vector<2x1xf32>
    %76 = arith.cmpf ogt, %74, %75 : vector<2x1xf32>
    %cst_28 = arith.constant -1.000000e+30 : f32
    %77 = vector.broadcast %cst_28 : f32 to vector<2x1xf32>
    %78 = arith.select %76, %73, %77 : vector<2x1xi1>, vector<2x1xf32>
    %79 = arith.maximumf %36, %78 : vector<2x1xf32>
    %80 = arith.subf %36, %79 : vector<2x1xf32>
    %81 = math.exp %80 : vector<2x1xf32>
    %82 = arith.subf %78, %79 : vector<2x1xf32>
    %83 = math.exp %82 : vector<2x1xf32>
    %84 = arith.mulf %83, %74 : vector<2x1xf32>
    %85 = arith.mulf %81, %37 : vector<2x1xf32>
    %86 = arith.addf %85, %84 : vector<2x1xf32>
    %87 = vector.broadcast %81 : vector<2x1xf32> to vector<2x32xf32>
    %88 = arith.mulf %87, %38 : vector<2x32xf32>
    %89 = vector.broadcast %84 : vector<2x1xf32> to vector<2x32xf32>
    %90 = arith.mulf %89, %65 : vector<2x32xf32>
    %91 = arith.addf %88, %90 : vector<2x32xf32>
    %92 = vector.extract_strided_slice %28 {offsets = [2, 0], sizes = [2, 96], strides = [1, 1]} : vector<16x96xf32> to vector<2x96xf32>
    %cst_29 = arith.constant dense<0.000000e+00> : vector<2x96xf32>
    %93 = tpu.matmul %65, %29, %cst_29 {dimension_numbers = #tpu.dot_dimension_numbers<[1], [0], [0], [1], [0, 0, 1, 1], [], []>} : vector<2x32xf32>, vector<32x96xf32>, vector<2x96xf32> -> vector<2x96xf32>
    %94 = arith.addf %92, %93 : vector<2x96xf32>
    %95 = vector.extract_strided_slice %94 {offsets = [0, 0], sizes = [2, 32], strides = [1, 1]} : vector<2x96xf32> to vector<2x32xf32>
    %96 = arith.negf %95 : vector<2x32xf32>
    %97 = math.exp %96 : vector<2x32xf32>
    %cst_30 = arith.constant 1.000000e+00 : f32
    %98 = vector.broadcast %cst_30 : f32 to vector<2x32xf32>
    %99 = arith.addf %98, %97 : vector<2x32xf32>
    %100 = arith.divf %98, %99 : vector<2x32xf32>
    %101 = vector.extract_strided_slice %94 {offsets = [0, 32], sizes = [2, 32], strides = [1, 1]} : vector<2x96xf32> to vector<2x32xf32>
    %102 = arith.negf %101 : vector<2x32xf32>
    %103 = math.exp %102 : vector<2x32xf32>
    %cst_31 = arith.constant 1.000000e+00 : f32
    %104 = vector.broadcast %cst_31 : f32 to vector<2x32xf32>
    %105 = arith.addf %104, %103 : vector<2x32xf32>
    %106 = arith.divf %104, %105 : vector<2x32xf32>
    %107 = vector.extract_strided_slice %92 {offsets = [0, 64], sizes = [2, 32], strides = [1, 1]} : vector<2x96xf32> to vector<2x32xf32>
    %108 = vector.extract_strided_slice %93 {offsets = [0, 64], sizes = [2, 32], strides = [1, 1]} : vector<2x96xf32> to vector<2x32xf32>
    %109 = vector.broadcast %30 : vector<1x32xf32> to vector<2x32xf32>
    %110 = arith.addf %108, %109 : vector<2x32xf32>
    %111 = arith.mulf %100, %110 : vector<2x32xf32>
    %112 = arith.addf %107, %111 : vector<2x32xf32>
    %113 = math.tanh %112 : vector<2x32xf32>
    %cst_32 = arith.constant 1.000000e+00 : f32
    %114 = vector.broadcast %cst_32 : f32 to vector<2x32xf32>
    %115 = arith.subf %114, %106 : vector<2x32xf32>
    %116 = arith.mulf %115, %113 : vector<2x32xf32>
    %117 = arith.mulf %106, %65 : vector<2x32xf32>
    %118 = arith.addf %116, %117 : vector<2x32xf32>
    %cst_33 = arith.constant dense<0.000000e+00> : vector<2x32xf32>
    %119 = tpu.matmul %118, %31, %cst_33 {dimension_numbers = #tpu.dot_dimension_numbers<[1], [0], [0], [1], [0, 0, 1, 1], [], []>} : vector<2x32xf32>, vector<32x32xf32>, vector<2x32xf32> -> vector<2x32xf32>
    %120 = vector.broadcast %32 : vector<1x32xf32> to vector<2x32xf32>
    %121 = arith.addf %119, %120 : vector<2x32xf32>
    %122 = math.tanh %121 : vector<2x32xf32>
    %123 = vector.broadcast %33 : vector<1x32xf32> to vector<2x32xf32>
    %124 = arith.mulf %122, %123 : vector<2x32xf32>
    %cst_34 = arith.constant dense<0.000000e+00> : vector<2xf32>
    %125 = vector.multi_reduction <add>, %124, %cst_34 [1] : vector<2x32xf32> to vector<2xf32>
    %126 = vector.shape_cast %125 : vector<2xf32> to vector<2x1xf32>
    %127 = vector.extract_strided_slice %34 {offsets = [0, 1], sizes = [2, 1], strides = [1, 1]} : vector<2x8xf32> to vector<2x1xf32>
    %cst_35 = arith.constant 0.000000e+00 : f32
    %128 = vector.broadcast %cst_35 : f32 to vector<2x1xf32>
    %129 = arith.cmpf ogt, %127, %128 : vector<2x1xf32>
    %cst_36 = arith.constant -1.000000e+30 : f32
    %130 = vector.broadcast %cst_36 : f32 to vector<2x1xf32>
    %131 = arith.select %129, %126, %130 : vector<2x1xi1>, vector<2x1xf32>
    %132 = arith.maximumf %79, %131 : vector<2x1xf32>
    %133 = arith.subf %79, %132 : vector<2x1xf32>
    %134 = math.exp %133 : vector<2x1xf32>
    %135 = arith.subf %131, %132 : vector<2x1xf32>
    %136 = math.exp %135 : vector<2x1xf32>
    %137 = arith.mulf %136, %127 : vector<2x1xf32>
    %138 = arith.mulf %134, %86 : vector<2x1xf32>
    %139 = arith.addf %138, %137 : vector<2x1xf32>
    %140 = vector.broadcast %134 : vector<2x1xf32> to vector<2x32xf32>
    %141 = arith.mulf %140, %91 : vector<2x32xf32>
    %142 = vector.broadcast %137 : vector<2x1xf32> to vector<2x32xf32>
    %143 = arith.mulf %142, %118 : vector<2x32xf32>
    %144 = arith.addf %141, %143 : vector<2x32xf32>
    %145 = vector.extract_strided_slice %28 {offsets = [4, 0], sizes = [2, 96], strides = [1, 1]} : vector<16x96xf32> to vector<2x96xf32>
    %cst_37 = arith.constant dense<0.000000e+00> : vector<2x96xf32>
    %146 = tpu.matmul %118, %29, %cst_37 {dimension_numbers = #tpu.dot_dimension_numbers<[1], [0], [0], [1], [0, 0, 1, 1], [], []>} : vector<2x32xf32>, vector<32x96xf32>, vector<2x96xf32> -> vector<2x96xf32>
    %147 = arith.addf %145, %146 : vector<2x96xf32>
    %148 = vector.extract_strided_slice %147 {offsets = [0, 0], sizes = [2, 32], strides = [1, 1]} : vector<2x96xf32> to vector<2x32xf32>
    %149 = arith.negf %148 : vector<2x32xf32>
    %150 = math.exp %149 : vector<2x32xf32>
    %cst_38 = arith.constant 1.000000e+00 : f32
    %151 = vector.broadcast %cst_38 : f32 to vector<2x32xf32>
    %152 = arith.addf %151, %150 : vector<2x32xf32>
    %153 = arith.divf %151, %152 : vector<2x32xf32>
    %154 = vector.extract_strided_slice %147 {offsets = [0, 32], sizes = [2, 32], strides = [1, 1]} : vector<2x96xf32> to vector<2x32xf32>
    %155 = arith.negf %154 : vector<2x32xf32>
    %156 = math.exp %155 : vector<2x32xf32>
    %cst_39 = arith.constant 1.000000e+00 : f32
    %157 = vector.broadcast %cst_39 : f32 to vector<2x32xf32>
    %158 = arith.addf %157, %156 : vector<2x32xf32>
    %159 = arith.divf %157, %158 : vector<2x32xf32>
    %160 = vector.extract_strided_slice %145 {offsets = [0, 64], sizes = [2, 32], strides = [1, 1]} : vector<2x96xf32> to vector<2x32xf32>
    %161 = vector.extract_strided_slice %146 {offsets = [0, 64], sizes = [2, 32], strides = [1, 1]} : vector<2x96xf32> to vector<2x32xf32>
    %162 = vector.broadcast %30 : vector<1x32xf32> to vector<2x32xf32>
    %163 = arith.addf %161, %162 : vector<2x32xf32>
    %164 = arith.mulf %153, %163 : vector<2x32xf32>
    %165 = arith.addf %160, %164 : vector<2x32xf32>
    %166 = math.tanh %165 : vector<2x32xf32>
    %cst_40 = arith.constant 1.000000e+00 : f32
    %167 = vector.broadcast %cst_40 : f32 to vector<2x32xf32>
    %168 = arith.subf %167, %159 : vector<2x32xf32>
    %169 = arith.mulf %168, %166 : vector<2x32xf32>
    %170 = arith.mulf %159, %118 : vector<2x32xf32>
    %171 = arith.addf %169, %170 : vector<2x32xf32>
    %cst_41 = arith.constant dense<0.000000e+00> : vector<2x32xf32>
    %172 = tpu.matmul %171, %31, %cst_41 {dimension_numbers = #tpu.dot_dimension_numbers<[1], [0], [0], [1], [0, 0, 1, 1], [], []>} : vector<2x32xf32>, vector<32x32xf32>, vector<2x32xf32> -> vector<2x32xf32>
    %173 = vector.broadcast %32 : vector<1x32xf32> to vector<2x32xf32>
    %174 = arith.addf %172, %173 : vector<2x32xf32>
    %175 = math.tanh %174 : vector<2x32xf32>
    %176 = vector.broadcast %33 : vector<1x32xf32> to vector<2x32xf32>
    %177 = arith.mulf %175, %176 : vector<2x32xf32>
    %cst_42 = arith.constant dense<0.000000e+00> : vector<2xf32>
    %178 = vector.multi_reduction <add>, %177, %cst_42 [1] : vector<2x32xf32> to vector<2xf32>
    %179 = vector.shape_cast %178 : vector<2xf32> to vector<2x1xf32>
    %180 = vector.extract_strided_slice %34 {offsets = [0, 2], sizes = [2, 1], strides = [1, 1]} : vector<2x8xf32> to vector<2x1xf32>
    %cst_43 = arith.constant 0.000000e+00 : f32
    %181 = vector.broadcast %cst_43 : f32 to vector<2x1xf32>
    %182 = arith.cmpf ogt, %180, %181 : vector<2x1xf32>
    %cst_44 = arith.constant -1.000000e+30 : f32
    %183 = vector.broadcast %cst_44 : f32 to vector<2x1xf32>
    %184 = arith.select %182, %179, %183 : vector<2x1xi1>, vector<2x1xf32>
    %185 = arith.maximumf %132, %184 : vector<2x1xf32>
    %186 = arith.subf %132, %185 : vector<2x1xf32>
    %187 = math.exp %186 : vector<2x1xf32>
    %188 = arith.subf %184, %185 : vector<2x1xf32>
    %189 = math.exp %188 : vector<2x1xf32>
    %190 = arith.mulf %189, %180 : vector<2x1xf32>
    %191 = arith.mulf %187, %139 : vector<2x1xf32>
    %192 = arith.addf %191, %190 : vector<2x1xf32>
    %193 = vector.broadcast %187 : vector<2x1xf32> to vector<2x32xf32>
    %194 = arith.mulf %193, %144 : vector<2x32xf32>
    %195 = vector.broadcast %190 : vector<2x1xf32> to vector<2x32xf32>
    %196 = arith.mulf %195, %171 : vector<2x32xf32>
    %197 = arith.addf %194, %196 : vector<2x32xf32>
    %198 = vector.extract_strided_slice %28 {offsets = [6, 0], sizes = [2, 96], strides = [1, 1]} : vector<16x96xf32> to vector<2x96xf32>
    %cst_45 = arith.constant dense<0.000000e+00> : vector<2x96xf32>
    %199 = tpu.matmul %171, %29, %cst_45 {dimension_numbers = #tpu.dot_dimension_numbers<[1], [0], [0], [1], [0, 0, 1, 1], [], []>} : vector<2x32xf32>, vector<32x96xf32>, vector<2x96xf32> -> vector<2x96xf32>
    %200 = arith.addf %198, %199 : vector<2x96xf32>
    %201 = vector.extract_strided_slice %200 {offsets = [0, 0], sizes = [2, 32], strides = [1, 1]} : vector<2x96xf32> to vector<2x32xf32>
    %202 = arith.negf %201 : vector<2x32xf32>
    %203 = math.exp %202 : vector<2x32xf32>
    %cst_46 = arith.constant 1.000000e+00 : f32
    %204 = vector.broadcast %cst_46 : f32 to vector<2x32xf32>
    %205 = arith.addf %204, %203 : vector<2x32xf32>
    %206 = arith.divf %204, %205 : vector<2x32xf32>
    %207 = vector.extract_strided_slice %200 {offsets = [0, 32], sizes = [2, 32], strides = [1, 1]} : vector<2x96xf32> to vector<2x32xf32>
    %208 = arith.negf %207 : vector<2x32xf32>
    %209 = math.exp %208 : vector<2x32xf32>
    %cst_47 = arith.constant 1.000000e+00 : f32
    %210 = vector.broadcast %cst_47 : f32 to vector<2x32xf32>
    %211 = arith.addf %210, %209 : vector<2x32xf32>
    %212 = arith.divf %210, %211 : vector<2x32xf32>
    %213 = vector.extract_strided_slice %198 {offsets = [0, 64], sizes = [2, 32], strides = [1, 1]} : vector<2x96xf32> to vector<2x32xf32>
    %214 = vector.extract_strided_slice %199 {offsets = [0, 64], sizes = [2, 32], strides = [1, 1]} : vector<2x96xf32> to vector<2x32xf32>
    %215 = vector.broadcast %30 : vector<1x32xf32> to vector<2x32xf32>
    %216 = arith.addf %214, %215 : vector<2x32xf32>
    %217 = arith.mulf %206, %216 : vector<2x32xf32>
    %218 = arith.addf %213, %217 : vector<2x32xf32>
    %219 = math.tanh %218 : vector<2x32xf32>
    %cst_48 = arith.constant 1.000000e+00 : f32
    %220 = vector.broadcast %cst_48 : f32 to vector<2x32xf32>
    %221 = arith.subf %220, %212 : vector<2x32xf32>
    %222 = arith.mulf %221, %219 : vector<2x32xf32>
    %223 = arith.mulf %212, %171 : vector<2x32xf32>
    %224 = arith.addf %222, %223 : vector<2x32xf32>
    %cst_49 = arith.constant dense<0.000000e+00> : vector<2x32xf32>
    %225 = tpu.matmul %224, %31, %cst_49 {dimension_numbers = #tpu.dot_dimension_numbers<[1], [0], [0], [1], [0, 0, 1, 1], [], []>} : vector<2x32xf32>, vector<32x32xf32>, vector<2x32xf32> -> vector<2x32xf32>
    %226 = vector.broadcast %32 : vector<1x32xf32> to vector<2x32xf32>
    %227 = arith.addf %225, %226 : vector<2x32xf32>
    %228 = math.tanh %227 : vector<2x32xf32>
    %229 = vector.broadcast %33 : vector<1x32xf32> to vector<2x32xf32>
    %230 = arith.mulf %228, %229 : vector<2x32xf32>
    %cst_50 = arith.constant dense<0.000000e+00> : vector<2xf32>
    %231 = vector.multi_reduction <add>, %230, %cst_50 [1] : vector<2x32xf32> to vector<2xf32>
    %232 = vector.shape_cast %231 : vector<2xf32> to vector<2x1xf32>
    %233 = vector.extract_strided_slice %34 {offsets = [0, 3], sizes = [2, 1], strides = [1, 1]} : vector<2x8xf32> to vector<2x1xf32>
    %cst_51 = arith.constant 0.000000e+00 : f32
    %234 = vector.broadcast %cst_51 : f32 to vector<2x1xf32>
    %235 = arith.cmpf ogt, %233, %234 : vector<2x1xf32>
    %cst_52 = arith.constant -1.000000e+30 : f32
    %236 = vector.broadcast %cst_52 : f32 to vector<2x1xf32>
    %237 = arith.select %235, %232, %236 : vector<2x1xi1>, vector<2x1xf32>
    %238 = arith.maximumf %185, %237 : vector<2x1xf32>
    %239 = arith.subf %185, %238 : vector<2x1xf32>
    %240 = math.exp %239 : vector<2x1xf32>
    %241 = arith.subf %237, %238 : vector<2x1xf32>
    %242 = math.exp %241 : vector<2x1xf32>
    %243 = arith.mulf %242, %233 : vector<2x1xf32>
    %244 = arith.mulf %240, %192 : vector<2x1xf32>
    %245 = arith.addf %244, %243 : vector<2x1xf32>
    %246 = vector.broadcast %240 : vector<2x1xf32> to vector<2x32xf32>
    %247 = arith.mulf %246, %197 : vector<2x32xf32>
    %248 = vector.broadcast %243 : vector<2x1xf32> to vector<2x32xf32>
    %249 = arith.mulf %248, %224 : vector<2x32xf32>
    %250 = arith.addf %247, %249 : vector<2x32xf32>
    %251 = vector.extract_strided_slice %28 {offsets = [8, 0], sizes = [2, 96], strides = [1, 1]} : vector<16x96xf32> to vector<2x96xf32>
    %cst_53 = arith.constant dense<0.000000e+00> : vector<2x96xf32>
    %252 = tpu.matmul %224, %29, %cst_53 {dimension_numbers = #tpu.dot_dimension_numbers<[1], [0], [0], [1], [0, 0, 1, 1], [], []>} : vector<2x32xf32>, vector<32x96xf32>, vector<2x96xf32> -> vector<2x96xf32>
    %253 = arith.addf %251, %252 : vector<2x96xf32>
    %254 = vector.extract_strided_slice %253 {offsets = [0, 0], sizes = [2, 32], strides = [1, 1]} : vector<2x96xf32> to vector<2x32xf32>
    %255 = arith.negf %254 : vector<2x32xf32>
    %256 = math.exp %255 : vector<2x32xf32>
    %cst_54 = arith.constant 1.000000e+00 : f32
    %257 = vector.broadcast %cst_54 : f32 to vector<2x32xf32>
    %258 = arith.addf %257, %256 : vector<2x32xf32>
    %259 = arith.divf %257, %258 : vector<2x32xf32>
    %260 = vector.extract_strided_slice %253 {offsets = [0, 32], sizes = [2, 32], strides = [1, 1]} : vector<2x96xf32> to vector<2x32xf32>
    %261 = arith.negf %260 : vector<2x32xf32>
    %262 = math.exp %261 : vector<2x32xf32>
    %cst_55 = arith.constant 1.000000e+00 : f32
    %263 = vector.broadcast %cst_55 : f32 to vector<2x32xf32>
    %264 = arith.addf %263, %262 : vector<2x32xf32>
    %265 = arith.divf %263, %264 : vector<2x32xf32>
    %266 = vector.extract_strided_slice %251 {offsets = [0, 64], sizes = [2, 32], strides = [1, 1]} : vector<2x96xf32> to vector<2x32xf32>
    %267 = vector.extract_strided_slice %252 {offsets = [0, 64], sizes = [2, 32], strides = [1, 1]} : vector<2x96xf32> to vector<2x32xf32>
    %268 = vector.broadcast %30 : vector<1x32xf32> to vector<2x32xf32>
    %269 = arith.addf %267, %268 : vector<2x32xf32>
    %270 = arith.mulf %259, %269 : vector<2x32xf32>
    %271 = arith.addf %266, %270 : vector<2x32xf32>
    %272 = math.tanh %271 : vector<2x32xf32>
    %cst_56 = arith.constant 1.000000e+00 : f32
    %273 = vector.broadcast %cst_56 : f32 to vector<2x32xf32>
    %274 = arith.subf %273, %265 : vector<2x32xf32>
    %275 = arith.mulf %274, %272 : vector<2x32xf32>
    %276 = arith.mulf %265, %224 : vector<2x32xf32>
    %277 = arith.addf %275, %276 : vector<2x32xf32>
    %cst_57 = arith.constant dense<0.000000e+00> : vector<2x32xf32>
    %278 = tpu.matmul %277, %31, %cst_57 {dimension_numbers = #tpu.dot_dimension_numbers<[1], [0], [0], [1], [0, 0, 1, 1], [], []>} : vector<2x32xf32>, vector<32x32xf32>, vector<2x32xf32> -> vector<2x32xf32>
    %279 = vector.broadcast %32 : vector<1x32xf32> to vector<2x32xf32>
    %280 = arith.addf %278, %279 : vector<2x32xf32>
    %281 = math.tanh %280 : vector<2x32xf32>
    %282 = vector.broadcast %33 : vector<1x32xf32> to vector<2x32xf32>
    %283 = arith.mulf %281, %282 : vector<2x32xf32>
    %cst_58 = arith.constant dense<0.000000e+00> : vector<2xf32>
    %284 = vector.multi_reduction <add>, %283, %cst_58 [1] : vector<2x32xf32> to vector<2xf32>
    %285 = vector.shape_cast %284 : vector<2xf32> to vector<2x1xf32>
    %286 = vector.extract_strided_slice %34 {offsets = [0, 4], sizes = [2, 1], strides = [1, 1]} : vector<2x8xf32> to vector<2x1xf32>
    %cst_59 = arith.constant 0.000000e+00 : f32
    %287 = vector.broadcast %cst_59 : f32 to vector<2x1xf32>
    %288 = arith.cmpf ogt, %286, %287 : vector<2x1xf32>
    %cst_60 = arith.constant -1.000000e+30 : f32
    %289 = vector.broadcast %cst_60 : f32 to vector<2x1xf32>
    %290 = arith.select %288, %285, %289 : vector<2x1xi1>, vector<2x1xf32>
    %291 = arith.maximumf %238, %290 : vector<2x1xf32>
    %292 = arith.subf %238, %291 : vector<2x1xf32>
    %293 = math.exp %292 : vector<2x1xf32>
    %294 = arith.subf %290, %291 : vector<2x1xf32>
    %295 = math.exp %294 : vector<2x1xf32>
    %296 = arith.mulf %295, %286 : vector<2x1xf32>
    %297 = arith.mulf %293, %245 : vector<2x1xf32>
    %298 = arith.addf %297, %296 : vector<2x1xf32>
    %299 = vector.broadcast %293 : vector<2x1xf32> to vector<2x32xf32>
    %300 = arith.mulf %299, %250 : vector<2x32xf32>
    %301 = vector.broadcast %296 : vector<2x1xf32> to vector<2x32xf32>
    %302 = arith.mulf %301, %277 : vector<2x32xf32>
    %303 = arith.addf %300, %302 : vector<2x32xf32>
    %304 = vector.extract_strided_slice %28 {offsets = [10, 0], sizes = [2, 96], strides = [1, 1]} : vector<16x96xf32> to vector<2x96xf32>
    %cst_61 = arith.constant dense<0.000000e+00> : vector<2x96xf32>
    %305 = tpu.matmul %277, %29, %cst_61 {dimension_numbers = #tpu.dot_dimension_numbers<[1], [0], [0], [1], [0, 0, 1, 1], [], []>} : vector<2x32xf32>, vector<32x96xf32>, vector<2x96xf32> -> vector<2x96xf32>
    %306 = arith.addf %304, %305 : vector<2x96xf32>
    %307 = vector.extract_strided_slice %306 {offsets = [0, 0], sizes = [2, 32], strides = [1, 1]} : vector<2x96xf32> to vector<2x32xf32>
    %308 = arith.negf %307 : vector<2x32xf32>
    %309 = math.exp %308 : vector<2x32xf32>
    %cst_62 = arith.constant 1.000000e+00 : f32
    %310 = vector.broadcast %cst_62 : f32 to vector<2x32xf32>
    %311 = arith.addf %310, %309 : vector<2x32xf32>
    %312 = arith.divf %310, %311 : vector<2x32xf32>
    %313 = vector.extract_strided_slice %306 {offsets = [0, 32], sizes = [2, 32], strides = [1, 1]} : vector<2x96xf32> to vector<2x32xf32>
    %314 = arith.negf %313 : vector<2x32xf32>
    %315 = math.exp %314 : vector<2x32xf32>
    %cst_63 = arith.constant 1.000000e+00 : f32
    %316 = vector.broadcast %cst_63 : f32 to vector<2x32xf32>
    %317 = arith.addf %316, %315 : vector<2x32xf32>
    %318 = arith.divf %316, %317 : vector<2x32xf32>
    %319 = vector.extract_strided_slice %304 {offsets = [0, 64], sizes = [2, 32], strides = [1, 1]} : vector<2x96xf32> to vector<2x32xf32>
    %320 = vector.extract_strided_slice %305 {offsets = [0, 64], sizes = [2, 32], strides = [1, 1]} : vector<2x96xf32> to vector<2x32xf32>
    %321 = vector.broadcast %30 : vector<1x32xf32> to vector<2x32xf32>
    %322 = arith.addf %320, %321 : vector<2x32xf32>
    %323 = arith.mulf %312, %322 : vector<2x32xf32>
    %324 = arith.addf %319, %323 : vector<2x32xf32>
    %325 = math.tanh %324 : vector<2x32xf32>
    %cst_64 = arith.constant 1.000000e+00 : f32
    %326 = vector.broadcast %cst_64 : f32 to vector<2x32xf32>
    %327 = arith.subf %326, %318 : vector<2x32xf32>
    %328 = arith.mulf %327, %325 : vector<2x32xf32>
    %329 = arith.mulf %318, %277 : vector<2x32xf32>
    %330 = arith.addf %328, %329 : vector<2x32xf32>
    %cst_65 = arith.constant dense<0.000000e+00> : vector<2x32xf32>
    %331 = tpu.matmul %330, %31, %cst_65 {dimension_numbers = #tpu.dot_dimension_numbers<[1], [0], [0], [1], [0, 0, 1, 1], [], []>} : vector<2x32xf32>, vector<32x32xf32>, vector<2x32xf32> -> vector<2x32xf32>
    %332 = vector.broadcast %32 : vector<1x32xf32> to vector<2x32xf32>
    %333 = arith.addf %331, %332 : vector<2x32xf32>
    %334 = math.tanh %333 : vector<2x32xf32>
    %335 = vector.broadcast %33 : vector<1x32xf32> to vector<2x32xf32>
    %336 = arith.mulf %334, %335 : vector<2x32xf32>
    %cst_66 = arith.constant dense<0.000000e+00> : vector<2xf32>
    %337 = vector.multi_reduction <add>, %336, %cst_66 [1] : vector<2x32xf32> to vector<2xf32>
    %338 = vector.shape_cast %337 : vector<2xf32> to vector<2x1xf32>
    %339 = vector.extract_strided_slice %34 {offsets = [0, 5], sizes = [2, 1], strides = [1, 1]} : vector<2x8xf32> to vector<2x1xf32>
    %cst_67 = arith.constant 0.000000e+00 : f32
    %340 = vector.broadcast %cst_67 : f32 to vector<2x1xf32>
    %341 = arith.cmpf ogt, %339, %340 : vector<2x1xf32>
    %cst_68 = arith.constant -1.000000e+30 : f32
    %342 = vector.broadcast %cst_68 : f32 to vector<2x1xf32>
    %343 = arith.select %341, %338, %342 : vector<2x1xi1>, vector<2x1xf32>
    %344 = arith.maximumf %291, %343 : vector<2x1xf32>
    %345 = arith.subf %291, %344 : vector<2x1xf32>
    %346 = math.exp %345 : vector<2x1xf32>
    %347 = arith.subf %343, %344 : vector<2x1xf32>
    %348 = math.exp %347 : vector<2x1xf32>
    %349 = arith.mulf %348, %339 : vector<2x1xf32>
    %350 = arith.mulf %346, %298 : vector<2x1xf32>
    %351 = arith.addf %350, %349 : vector<2x1xf32>
    %352 = vector.broadcast %346 : vector<2x1xf32> to vector<2x32xf32>
    %353 = arith.mulf %352, %303 : vector<2x32xf32>
    %354 = vector.broadcast %349 : vector<2x1xf32> to vector<2x32xf32>
    %355 = arith.mulf %354, %330 : vector<2x32xf32>
    %356 = arith.addf %353, %355 : vector<2x32xf32>
    %357 = vector.extract_strided_slice %28 {offsets = [12, 0], sizes = [2, 96], strides = [1, 1]} : vector<16x96xf32> to vector<2x96xf32>
    %cst_69 = arith.constant dense<0.000000e+00> : vector<2x96xf32>
    %358 = tpu.matmul %330, %29, %cst_69 {dimension_numbers = #tpu.dot_dimension_numbers<[1], [0], [0], [1], [0, 0, 1, 1], [], []>} : vector<2x32xf32>, vector<32x96xf32>, vector<2x96xf32> -> vector<2x96xf32>
    %359 = arith.addf %357, %358 : vector<2x96xf32>
    %360 = vector.extract_strided_slice %359 {offsets = [0, 0], sizes = [2, 32], strides = [1, 1]} : vector<2x96xf32> to vector<2x32xf32>
    %361 = arith.negf %360 : vector<2x32xf32>
    %362 = math.exp %361 : vector<2x32xf32>
    %cst_70 = arith.constant 1.000000e+00 : f32
    %363 = vector.broadcast %cst_70 : f32 to vector<2x32xf32>
    %364 = arith.addf %363, %362 : vector<2x32xf32>
    %365 = arith.divf %363, %364 : vector<2x32xf32>
    %366 = vector.extract_strided_slice %359 {offsets = [0, 32], sizes = [2, 32], strides = [1, 1]} : vector<2x96xf32> to vector<2x32xf32>
    %367 = arith.negf %366 : vector<2x32xf32>
    %368 = math.exp %367 : vector<2x32xf32>
    %cst_71 = arith.constant 1.000000e+00 : f32
    %369 = vector.broadcast %cst_71 : f32 to vector<2x32xf32>
    %370 = arith.addf %369, %368 : vector<2x32xf32>
    %371 = arith.divf %369, %370 : vector<2x32xf32>
    %372 = vector.extract_strided_slice %357 {offsets = [0, 64], sizes = [2, 32], strides = [1, 1]} : vector<2x96xf32> to vector<2x32xf32>
    %373 = vector.extract_strided_slice %358 {offsets = [0, 64], sizes = [2, 32], strides = [1, 1]} : vector<2x96xf32> to vector<2x32xf32>
    %374 = vector.broadcast %30 : vector<1x32xf32> to vector<2x32xf32>
    %375 = arith.addf %373, %374 : vector<2x32xf32>
    %376 = arith.mulf %365, %375 : vector<2x32xf32>
    %377 = arith.addf %372, %376 : vector<2x32xf32>
    %378 = math.tanh %377 : vector<2x32xf32>
    %cst_72 = arith.constant 1.000000e+00 : f32
    %379 = vector.broadcast %cst_72 : f32 to vector<2x32xf32>
    %380 = arith.subf %379, %371 : vector<2x32xf32>
    %381 = arith.mulf %380, %378 : vector<2x32xf32>
    %382 = arith.mulf %371, %330 : vector<2x32xf32>
    %383 = arith.addf %381, %382 : vector<2x32xf32>
    %cst_73 = arith.constant dense<0.000000e+00> : vector<2x32xf32>
    %384 = tpu.matmul %383, %31, %cst_73 {dimension_numbers = #tpu.dot_dimension_numbers<[1], [0], [0], [1], [0, 0, 1, 1], [], []>} : vector<2x32xf32>, vector<32x32xf32>, vector<2x32xf32> -> vector<2x32xf32>
    %385 = vector.broadcast %32 : vector<1x32xf32> to vector<2x32xf32>
    %386 = arith.addf %384, %385 : vector<2x32xf32>
    %387 = math.tanh %386 : vector<2x32xf32>
    %388 = vector.broadcast %33 : vector<1x32xf32> to vector<2x32xf32>
    %389 = arith.mulf %387, %388 : vector<2x32xf32>
    %cst_74 = arith.constant dense<0.000000e+00> : vector<2xf32>
    %390 = vector.multi_reduction <add>, %389, %cst_74 [1] : vector<2x32xf32> to vector<2xf32>
    %391 = vector.shape_cast %390 : vector<2xf32> to vector<2x1xf32>
    %392 = vector.extract_strided_slice %34 {offsets = [0, 6], sizes = [2, 1], strides = [1, 1]} : vector<2x8xf32> to vector<2x1xf32>
    %cst_75 = arith.constant 0.000000e+00 : f32
    %393 = vector.broadcast %cst_75 : f32 to vector<2x1xf32>
    %394 = arith.cmpf ogt, %392, %393 : vector<2x1xf32>
    %cst_76 = arith.constant -1.000000e+30 : f32
    %395 = vector.broadcast %cst_76 : f32 to vector<2x1xf32>
    %396 = arith.select %394, %391, %395 : vector<2x1xi1>, vector<2x1xf32>
    %397 = arith.maximumf %344, %396 : vector<2x1xf32>
    %398 = arith.subf %344, %397 : vector<2x1xf32>
    %399 = math.exp %398 : vector<2x1xf32>
    %400 = arith.subf %396, %397 : vector<2x1xf32>
    %401 = math.exp %400 : vector<2x1xf32>
    %402 = arith.mulf %401, %392 : vector<2x1xf32>
    %403 = arith.mulf %399, %351 : vector<2x1xf32>
    %404 = arith.addf %403, %402 : vector<2x1xf32>
    %405 = vector.broadcast %399 : vector<2x1xf32> to vector<2x32xf32>
    %406 = arith.mulf %405, %356 : vector<2x32xf32>
    %407 = vector.broadcast %402 : vector<2x1xf32> to vector<2x32xf32>
    %408 = arith.mulf %407, %383 : vector<2x32xf32>
    %409 = arith.addf %406, %408 : vector<2x32xf32>
    %410 = vector.extract_strided_slice %28 {offsets = [14, 0], sizes = [2, 96], strides = [1, 1]} : vector<16x96xf32> to vector<2x96xf32>
    %cst_77 = arith.constant dense<0.000000e+00> : vector<2x96xf32>
    %411 = tpu.matmul %383, %29, %cst_77 {dimension_numbers = #tpu.dot_dimension_numbers<[1], [0], [0], [1], [0, 0, 1, 1], [], []>} : vector<2x32xf32>, vector<32x96xf32>, vector<2x96xf32> -> vector<2x96xf32>
    %412 = arith.addf %410, %411 : vector<2x96xf32>
    %413 = vector.extract_strided_slice %412 {offsets = [0, 0], sizes = [2, 32], strides = [1, 1]} : vector<2x96xf32> to vector<2x32xf32>
    %414 = arith.negf %413 : vector<2x32xf32>
    %415 = math.exp %414 : vector<2x32xf32>
    %cst_78 = arith.constant 1.000000e+00 : f32
    %416 = vector.broadcast %cst_78 : f32 to vector<2x32xf32>
    %417 = arith.addf %416, %415 : vector<2x32xf32>
    %418 = arith.divf %416, %417 : vector<2x32xf32>
    %419 = vector.extract_strided_slice %412 {offsets = [0, 32], sizes = [2, 32], strides = [1, 1]} : vector<2x96xf32> to vector<2x32xf32>
    %420 = arith.negf %419 : vector<2x32xf32>
    %421 = math.exp %420 : vector<2x32xf32>
    %cst_79 = arith.constant 1.000000e+00 : f32
    %422 = vector.broadcast %cst_79 : f32 to vector<2x32xf32>
    %423 = arith.addf %422, %421 : vector<2x32xf32>
    %424 = arith.divf %422, %423 : vector<2x32xf32>
    %425 = vector.extract_strided_slice %410 {offsets = [0, 64], sizes = [2, 32], strides = [1, 1]} : vector<2x96xf32> to vector<2x32xf32>
    %426 = vector.extract_strided_slice %411 {offsets = [0, 64], sizes = [2, 32], strides = [1, 1]} : vector<2x96xf32> to vector<2x32xf32>
    %427 = vector.broadcast %30 : vector<1x32xf32> to vector<2x32xf32>
    %428 = arith.addf %426, %427 : vector<2x32xf32>
    %429 = arith.mulf %418, %428 : vector<2x32xf32>
    %430 = arith.addf %425, %429 : vector<2x32xf32>
    %431 = math.tanh %430 : vector<2x32xf32>
    %cst_80 = arith.constant 1.000000e+00 : f32
    %432 = vector.broadcast %cst_80 : f32 to vector<2x32xf32>
    %433 = arith.subf %432, %424 : vector<2x32xf32>
    %434 = arith.mulf %433, %431 : vector<2x32xf32>
    %435 = arith.mulf %424, %383 : vector<2x32xf32>
    %436 = arith.addf %434, %435 : vector<2x32xf32>
    %cst_81 = arith.constant dense<0.000000e+00> : vector<2x32xf32>
    %437 = tpu.matmul %436, %31, %cst_81 {dimension_numbers = #tpu.dot_dimension_numbers<[1], [0], [0], [1], [0, 0, 1, 1], [], []>} : vector<2x32xf32>, vector<32x32xf32>, vector<2x32xf32> -> vector<2x32xf32>
    %438 = vector.broadcast %32 : vector<1x32xf32> to vector<2x32xf32>
    %439 = arith.addf %437, %438 : vector<2x32xf32>
    %440 = math.tanh %439 : vector<2x32xf32>
    %441 = vector.broadcast %33 : vector<1x32xf32> to vector<2x32xf32>
    %442 = arith.mulf %440, %441 : vector<2x32xf32>
    %cst_82 = arith.constant dense<0.000000e+00> : vector<2xf32>
    %443 = vector.multi_reduction <add>, %442, %cst_82 [1] : vector<2x32xf32> to vector<2xf32>
    %444 = vector.shape_cast %443 : vector<2xf32> to vector<2x1xf32>
    %445 = vector.extract_strided_slice %34 {offsets = [0, 7], sizes = [2, 1], strides = [1, 1]} : vector<2x8xf32> to vector<2x1xf32>
    %cst_83 = arith.constant 0.000000e+00 : f32
    %446 = vector.broadcast %cst_83 : f32 to vector<2x1xf32>
    %447 = arith.cmpf ogt, %445, %446 : vector<2x1xf32>
    %cst_84 = arith.constant -1.000000e+30 : f32
    %448 = vector.broadcast %cst_84 : f32 to vector<2x1xf32>
    %449 = arith.select %447, %444, %448 : vector<2x1xi1>, vector<2x1xf32>
    %450 = arith.maximumf %397, %449 : vector<2x1xf32>
    %451 = arith.subf %397, %450 : vector<2x1xf32>
    %452 = math.exp %451 : vector<2x1xf32>
    %453 = arith.subf %449, %450 : vector<2x1xf32>
    %454 = math.exp %453 : vector<2x1xf32>
    %455 = arith.mulf %454, %445 : vector<2x1xf32>
    %456 = arith.mulf %452, %404 : vector<2x1xf32>
    %457 = arith.addf %456, %455 : vector<2x1xf32>
    %458 = vector.broadcast %452 : vector<2x1xf32> to vector<2x32xf32>
    %459 = arith.mulf %458, %409 : vector<2x32xf32>
    %460 = vector.broadcast %455 : vector<2x1xf32> to vector<2x32xf32>
    %461 = arith.mulf %460, %436 : vector<2x32xf32>
    %462 = arith.addf %459, %461 : vector<2x32xf32>
    %463 = tpu.iota {dimensions = array<i32: 1>} : vector<2x8xi32>
    %cst_85 = arith.constant 0.000000e+00 : f32
    %464 = vector.broadcast %cst_85 : f32 to vector<2x8xf32>
    %c0_i32 = arith.constant 0 : i32
    %465 = vector.broadcast %c0_i32 : i32 to vector<2x8xi32>
    %466 = arith.cmpi eq, %463, %465 : vector<2x8xi32>
    %467 = vector.shape_cast %73 : vector<2x1xf32> to vector<2x1xf32>
    %468 = vector.broadcast %467 : vector<2x1xf32> to vector<2x8xf32>
    %469 = arith.select %466, %468, %464 : vector<2x8xi1>, vector<2x8xf32>
    %c1_i32 = arith.constant 1 : i32
    %470 = vector.broadcast %c1_i32 : i32 to vector<2x8xi32>
    %471 = arith.cmpi eq, %463, %470 : vector<2x8xi32>
    %472 = vector.shape_cast %126 : vector<2x1xf32> to vector<2x1xf32>
    %473 = vector.broadcast %472 : vector<2x1xf32> to vector<2x8xf32>
    %474 = arith.select %471, %473, %469 : vector<2x8xi1>, vector<2x8xf32>
    %c2_i32 = arith.constant 2 : i32
    %475 = vector.broadcast %c2_i32 : i32 to vector<2x8xi32>
    %476 = arith.cmpi eq, %463, %475 : vector<2x8xi32>
    %477 = vector.shape_cast %179 : vector<2x1xf32> to vector<2x1xf32>
    %478 = vector.broadcast %477 : vector<2x1xf32> to vector<2x8xf32>
    %479 = arith.select %476, %478, %474 : vector<2x8xi1>, vector<2x8xf32>
    %c3_i32 = arith.constant 3 : i32
    %480 = vector.broadcast %c3_i32 : i32 to vector<2x8xi32>
    %481 = arith.cmpi eq, %463, %480 : vector<2x8xi32>
    %482 = vector.shape_cast %232 : vector<2x1xf32> to vector<2x1xf32>
    %483 = vector.broadcast %482 : vector<2x1xf32> to vector<2x8xf32>
    %484 = arith.select %481, %483, %479 : vector<2x8xi1>, vector<2x8xf32>
    %c4_i32 = arith.constant 4 : i32
    %485 = vector.broadcast %c4_i32 : i32 to vector<2x8xi32>
    %486 = arith.cmpi eq, %463, %485 : vector<2x8xi32>
    %487 = vector.shape_cast %285 : vector<2x1xf32> to vector<2x1xf32>
    %488 = vector.broadcast %487 : vector<2x1xf32> to vector<2x8xf32>
    %489 = arith.select %486, %488, %484 : vector<2x8xi1>, vector<2x8xf32>
    %c5_i32 = arith.constant 5 : i32
    %490 = vector.broadcast %c5_i32 : i32 to vector<2x8xi32>
    %491 = arith.cmpi eq, %463, %490 : vector<2x8xi32>
    %492 = vector.shape_cast %338 : vector<2x1xf32> to vector<2x1xf32>
    %493 = vector.broadcast %492 : vector<2x1xf32> to vector<2x8xf32>
    %494 = arith.select %491, %493, %489 : vector<2x8xi1>, vector<2x8xf32>
    %c6_i32 = arith.constant 6 : i32
    %495 = vector.broadcast %c6_i32 : i32 to vector<2x8xi32>
    %496 = arith.cmpi eq, %463, %495 : vector<2x8xi32>
    %497 = vector.shape_cast %391 : vector<2x1xf32> to vector<2x1xf32>
    %498 = vector.broadcast %497 : vector<2x1xf32> to vector<2x8xf32>
    %499 = arith.select %496, %498, %494 : vector<2x8xi1>, vector<2x8xf32>
    %c7_i32 = arith.constant 7 : i32
    %500 = vector.broadcast %c7_i32 : i32 to vector<2x8xi32>
    %501 = arith.cmpi eq, %463, %500 : vector<2x8xi32>
    %502 = vector.shape_cast %444 : vector<2x1xf32> to vector<2x1xf32>
    %503 = vector.broadcast %502 : vector<2x1xf32> to vector<2x8xf32>
    %504 = arith.select %501, %503, %499 : vector<2x8xi1>, vector<2x8xf32>
    %c0_86 = arith.constant 0 : index
    %c0_87 = arith.constant 0 : index
    %505 = vector.load %arg17[%c0_86, %c0_87] : memref<2x8xf32, #tpu.memory_space<vmem>>, vector<2x8xf32>
    tpu.vector_store %arg17[%c0_86, %c0_87], %504 {strides = array<i32>} : memref<2x8xf32, #tpu.memory_space<vmem>>, vector<2x8xf32>,
    %cst_88 = arith.constant 0.000000e+00 : f32
    %506 = vector.broadcast %cst_88 : f32 to vector<2x8xf32>
    %507 = arith.cmpf ogt, %34, %506 : vector<2x8xf32>
    %cst_89 = arith.constant -1.000000e+30 : f32
    %508 = vector.broadcast %cst_89 : f32 to vector<2x8xf32>
    %509 = arith.select %507, %504, %508 : vector<2x8xi1>, vector<2x8xf32>
    %cst_90 = arith.constant dense<0xFF800000> : vector<2xf32>
    %510 = vector.multi_reduction <maximumf>, %509, %cst_90 [1] : vector<2x8xf32> to vector<2xf32>
    %511 = vector.shape_cast %510 : vector<2xf32> to vector<2x1xf32>
    %512 = vector.broadcast %511 : vector<2x1xf32> to vector<2x8xf32>
    %513 = arith.subf %509, %512 : vector<2x8xf32>
    %514 = math.exp %513 : vector<2x8xf32>
    %515 = arith.mulf %514, %34 : vector<2x8xf32>
    %cst_91 = arith.constant dense<0.000000e+00> : vector<2xf32>
    %516 = vector.multi_reduction <add>, %515, %cst_91 [1] : vector<2x8xf32> to vector<2xf32>
    %517 = vector.shape_cast %516 : vector<2xf32> to vector<2x1xf32>
    %cst_92 = arith.constant 9.99999968E-21 : f32
    %518 = vector.broadcast %cst_92 : f32 to vector<2x1xf32>
    %519 = arith.maximumf %517, %518 : vector<2x1xf32>
    %520 = vector.broadcast %519 : vector<2x1xf32> to vector<2x8xf32>
    %521 = arith.divf %515, %520 : vector<2x8xf32>
    %c0_93 = arith.constant 0 : index
    %c0_94 = arith.constant 0 : index
    %522 = vector.load %arg18[%c0_93, %c0_94] : memref<2x8xf32, #tpu.memory_space<vmem>>, vector<2x8xf32>
    tpu.vector_store %arg18[%c0_93, %c0_94], %521 {strides = array<i32>} : memref<2x8xf32, #tpu.memory_space<vmem>>, vector<2x8xf32>,
    %cst_95 = arith.constant 9.99999968E-21 : f32
    %523 = vector.broadcast %cst_95 : f32 to vector<2x1xf32>
    %524 = arith.maximumf %457, %523 : vector<2x1xf32>
    %525 = tpu.reciprocal %524 {approx = true} : vector<2x1xf32> -> vector<2x1xf32>
    %526 = vector.broadcast %525 : vector<2x1xf32> to vector<2x32xf32>
    %527 = arith.mulf %462, %526 : vector<2x32xf32>
    %c0_96 = arith.constant 0 : index
    %c0_97 = arith.constant 0 : index
    %528 = vector.load %arg10[%c0_96, %c0_97] : memref<1x96xf32, #tpu.memory_space<vmem>>, vector<1x96xf32>
    %c0_98 = arith.constant 0 : index
    %c0_99 = arith.constant 0 : index
    %529 = vector.load %arg11[%c0_98, %c0_99] : memref<1x96xf32, #tpu.memory_space<vmem>>, vector<1x96xf32>
    %c0_100 = arith.constant 0 : index
    %c0_101 = arith.constant 0 : index
    %530 = vector.load %arg12[%c0_100, %c0_101] : memref<32x96xf32, #tpu.memory_space<vmem>>, vector<32x96xf32>
    %c0_102 = arith.constant 0 : index
    %c0_103 = arith.constant 0 : index
    %531 = vector.load %arg13[%c0_102, %c0_103] : memref<1x32xf32, #tpu.memory_space<vmem>>, vector<1x32xf32>
    %c0_104 = arith.constant 0 : index
    %c0_105 = arith.constant 0 : index
    %532 = vector.load %arg14[%c0_104, %c0_105] : memref<1x32xf32, #tpu.memory_space<vmem>>, vector<1x32xf32>
    %c0_106 = arith.constant 0 : index
    %c0_107 = arith.constant 0 : index
    %533 = vector.load %arg15[%c0_106, %c0_107] : memref<1x1xf32, #tpu.memory_space<vmem>>, vector<1x1xf32>
    %cst_108 = arith.constant 0.000000e+00 : f32
    %534 = vector.broadcast %cst_108 : f32 to vector<2x1xf32>
    %535 = vector.broadcast %534 : vector<2x1xf32> to vector<2x96xf32>
    %536 = vector.broadcast %528 : vector<1x96xf32> to vector<2x96xf32>
    %537 = arith.mulf %535, %536 : vector<2x96xf32>
    %538 = vector.broadcast %529 : vector<1x96xf32> to vector<2x96xf32>
    %539 = arith.addf %537, %538 : vector<2x96xf32>
    %cst_109 = arith.constant dense<0.000000e+00> : vector<2x96xf32>
    %540 = tpu.matmul %527, %530, %cst_109 {dimension_numbers = #tpu.dot_dimension_numbers<[1], [0], [0], [1], [0, 0, 1, 1], [], []>} : vector<2x32xf32>, vector<32x96xf32>, vector<2x96xf32> -> vector<2x96xf32>
    %541 = arith.addf %539, %540 : vector<2x96xf32>
    %542 = vector.extract_strided_slice %541 {offsets = [0, 0], sizes = [2, 32], strides = [1, 1]} : vector<2x96xf32> to vector<2x32xf32>
    %543 = arith.negf %542 : vector<2x32xf32>
    %544 = math.exp %543 : vector<2x32xf32>
    %cst_110 = arith.constant 1.000000e+00 : f32
    %545 = vector.broadcast %cst_110 : f32 to vector<2x32xf32>
    %546 = arith.addf %545, %544 : vector<2x32xf32>
    %547 = arith.divf %545, %546 : vector<2x32xf32>
    %548 = vector.extract_strided_slice %541 {offsets = [0, 32], sizes = [2, 32], strides = [1, 1]} : vector<2x96xf32> to vector<2x32xf32>
    %549 = arith.negf %548 : vector<2x32xf32>
    %550 = math.exp %549 : vector<2x32xf32>
    %cst_111 = arith.constant 1.000000e+00 : f32
    %551 = vector.broadcast %cst_111 : f32 to vector<2x32xf32>
    %552 = arith.addf %551, %550 : vector<2x32xf32>
    %553 = arith.divf %551, %552 : vector<2x32xf32>
    %554 = vector.extract_strided_slice %539 {offsets = [0, 64], sizes = [2, 32], strides = [1, 1]} : vector<2x96xf32> to vector<2x32xf32>
    %555 = vector.extract_strided_slice %540 {offsets = [0, 64], sizes = [2, 32], strides = [1, 1]} : vector<2x96xf32> to vector<2x32xf32>
    %556 = vector.broadcast %531 : vector<1x32xf32> to vector<2x32xf32>
    %557 = arith.addf %555, %556 : vector<2x32xf32>
    %558 = arith.mulf %547, %557 : vector<2x32xf32>
    %559 = arith.addf %554, %558 : vector<2x32xf32>
    %560 = math.tanh %559 : vector<2x32xf32>
    %cst_112 = arith.constant 1.000000e+00 : f32
    %561 = vector.broadcast %cst_112 : f32 to vector<2x32xf32>
    %562 = arith.subf %561, %553 : vector<2x32xf32>
    %563 = arith.mulf %562, %560 : vector<2x32xf32>
    %564 = arith.mulf %553, %527 : vector<2x32xf32>
    %565 = arith.addf %563, %564 : vector<2x32xf32>
    %566 = vector.broadcast %532 : vector<1x32xf32> to vector<2x32xf32>
    %567 = arith.mulf %565, %566 : vector<2x32xf32>
    %cst_113 = arith.constant dense<0.000000e+00> : vector<2xf32>
    %568 = vector.multi_reduction <add>, %567, %cst_113 [1] : vector<2x32xf32> to vector<2xf32>
    %569 = vector.shape_cast %568 : vector<2xf32> to vector<2x1xf32>
    %570 = vector.broadcast %533 : vector<1x1xf32> to vector<2x1xf32>
    %571 = arith.addf %569, %570 : vector<2x1xf32>
    %572 = vector.broadcast %571 : vector<2x1xf32> to vector<2x96xf32>
    %573 = vector.broadcast %528 : vector<1x96xf32> to vector<2x96xf32>
    %574 = arith.mulf %572, %573 : vector<2x96xf32>
    %575 = vector.broadcast %529 : vector<1x96xf32> to vector<2x96xf32>
    %576 = arith.addf %574, %575 : vector<2x96xf32>
    %cst_114 = arith.constant dense<0.000000e+00> : vector<2x96xf32>
    %577 = tpu.matmul %565, %530, %cst_114 {dimension_numbers = #tpu.dot_dimension_numbers<[1], [0], [0], [1], [0, 0, 1, 1], [], []>} : vector<2x32xf32>, vector<32x96xf32>, vector<2x96xf32> -> vector<2x96xf32>
    %578 = arith.addf %576, %577 : vector<2x96xf32>
    %579 = vector.extract_strided_slice %578 {offsets = [0, 0], sizes = [2, 32], strides = [1, 1]} : vector<2x96xf32> to vector<2x32xf32>
    %580 = arith.negf %579 : vector<2x32xf32>
    %581 = math.exp %580 : vector<2x32xf32>
    %cst_115 = arith.constant 1.000000e+00 : f32
    %582 = vector.broadcast %cst_115 : f32 to vector<2x32xf32>
    %583 = arith.addf %582, %581 : vector<2x32xf32>
    %584 = arith.divf %582, %583 : vector<2x32xf32>
    %585 = vector.extract_strided_slice %578 {offsets = [0, 32], sizes = [2, 32], strides = [1, 1]} : vector<2x96xf32> to vector<2x32xf32>
    %586 = arith.negf %585 : vector<2x32xf32>
    %587 = math.exp %586 : vector<2x32xf32>
    %cst_116 = arith.constant 1.000000e+00 : f32
    %588 = vector.broadcast %cst_116 : f32 to vector<2x32xf32>
    %589 = arith.addf %588, %587 : vector<2x32xf32>
    %590 = arith.divf %588, %589 : vector<2x32xf32>
    %591 = vector.extract_strided_slice %576 {offsets = [0, 64], sizes = [2, 32], strides = [1, 1]} : vector<2x96xf32> to vector<2x32xf32>
    %592 = vector.extract_strided_slice %577 {offsets = [0, 64], sizes = [2, 32], strides = [1, 1]} : vector<2x96xf32> to vector<2x32xf32>
    %593 = vector.broadcast %531 : vector<1x32xf32> to vector<2x32xf32>
    %594 = arith.addf %592, %593 : vector<2x32xf32>
    %595 = arith.mulf %584, %594 : vector<2x32xf32>
    %596 = arith.addf %591, %595 : vector<2x32xf32>
    %597 = math.tanh %596 : vector<2x32xf32>
    %cst_117 = arith.constant 1.000000e+00 : f32
    %598 = vector.broadcast %cst_117 : f32 to vector<2x32xf32>
    %599 = arith.subf %598, %590 : vector<2x32xf32>
    %600 = arith.mulf %599, %597 : vector<2x32xf32>
    %601 = arith.mulf %590, %565 : vector<2x32xf32>
    %602 = arith.addf %600, %601 : vector<2x32xf32>
    %603 = vector.broadcast %532 : vector<1x32xf32> to vector<2x32xf32>
    %604 = arith.mulf %602, %603 : vector<2x32xf32>
    %cst_118 = arith.constant dense<0.000000e+00> : vector<2xf32>
    %605 = vector.multi_reduction <add>, %604, %cst_118 [1] : vector<2x32xf32> to vector<2xf32>
    %606 = vector.shape_cast %605 : vector<2xf32> to vector<2x1xf32>
    %607 = vector.broadcast %533 : vector<1x1xf32> to vector<2x1xf32>
    %608 = arith.addf %606, %607 : vector<2x1xf32>
    %609 = vector.broadcast %608 : vector<2x1xf32> to vector<2x96xf32>
    %610 = vector.broadcast %528 : vector<1x96xf32> to vector<2x96xf32>
    %611 = arith.mulf %609, %610 : vector<2x96xf32>
    %612 = vector.broadcast %529 : vector<1x96xf32> to vector<2x96xf32>
    %613 = arith.addf %611, %612 : vector<2x96xf32>
    %cst_119 = arith.constant dense<0.000000e+00> : vector<2x96xf32>
    %614 = tpu.matmul %602, %530, %cst_119 {dimension_numbers = #tpu.dot_dimension_numbers<[1], [0], [0], [1], [0, 0, 1, 1], [], []>} : vector<2x32xf32>, vector<32x96xf32>, vector<2x96xf32> -> vector<2x96xf32>
    %615 = arith.addf %613, %614 : vector<2x96xf32>
    %616 = vector.extract_strided_slice %615 {offsets = [0, 0], sizes = [2, 32], strides = [1, 1]} : vector<2x96xf32> to vector<2x32xf32>
    %617 = arith.negf %616 : vector<2x32xf32>
    %618 = math.exp %617 : vector<2x32xf32>
    %cst_120 = arith.constant 1.000000e+00 : f32
    %619 = vector.broadcast %cst_120 : f32 to vector<2x32xf32>
    %620 = arith.addf %619, %618 : vector<2x32xf32>
    %621 = arith.divf %619, %620 : vector<2x32xf32>
    %622 = vector.extract_strided_slice %615 {offsets = [0, 32], sizes = [2, 32], strides = [1, 1]} : vector<2x96xf32> to vector<2x32xf32>
    %623 = arith.negf %622 : vector<2x32xf32>
    %624 = math.exp %623 : vector<2x32xf32>
    %cst_121 = arith.constant 1.000000e+00 : f32
    %625 = vector.broadcast %cst_121 : f32 to vector<2x32xf32>
    %626 = arith.addf %625, %624 : vector<2x32xf32>
    %627 = arith.divf %625, %626 : vector<2x32xf32>
    %628 = vector.extract_strided_slice %613 {offsets = [0, 64], sizes = [2, 32], strides = [1, 1]} : vector<2x96xf32> to vector<2x32xf32>
    %629 = vector.extract_strided_slice %614 {offsets = [0, 64], sizes = [2, 32], strides = [1, 1]} : vector<2x96xf32> to vector<2x32xf32>
    %630 = vector.broadcast %531 : vector<1x32xf32> to vector<2x32xf32>
    %631 = arith.addf %629, %630 : vector<2x32xf32>
    %632 = arith.mulf %621, %631 : vector<2x32xf32>
    %633 = arith.addf %628, %632 : vector<2x32xf32>
    %634 = math.tanh %633 : vector<2x32xf32>
    %cst_122 = arith.constant 1.000000e+00 : f32
    %635 = vector.broadcast %cst_122 : f32 to vector<2x32xf32>
    %636 = arith.subf %635, %627 : vector<2x32xf32>
    %637 = arith.mulf %636, %634 : vector<2x32xf32>
    %638 = arith.mulf %627, %602 : vector<2x32xf32>
    %639 = arith.addf %637, %638 : vector<2x32xf32>
    %640 = vector.broadcast %532 : vector<1x32xf32> to vector<2x32xf32>
    %641 = arith.mulf %639, %640 : vector<2x32xf32>
    %cst_123 = arith.constant dense<0.000000e+00> : vector<2xf32>
    %642 = vector.multi_reduction <add>, %641, %cst_123 [1] : vector<2x32xf32> to vector<2xf32>
    %643 = vector.shape_cast %642 : vector<2xf32> to vector<2x1xf32>
    %644 = vector.broadcast %533 : vector<1x1xf32> to vector<2x1xf32>
    %645 = arith.addf %643, %644 : vector<2x1xf32>
    %646 = vector.broadcast %645 : vector<2x1xf32> to vector<2x96xf32>
    %647 = vector.broadcast %528 : vector<1x96xf32> to vector<2x96xf32>
    %648 = arith.mulf %646, %647 : vector<2x96xf32>
    %649 = vector.broadcast %529 : vector<1x96xf32> to vector<2x96xf32>
    %650 = arith.addf %648, %649 : vector<2x96xf32>
    %cst_124 = arith.constant dense<0.000000e+00> : vector<2x96xf32>
    %651 = tpu.matmul %639, %530, %cst_124 {dimension_numbers = #tpu.dot_dimension_numbers<[1], [0], [0], [1], [0, 0, 1, 1], [], []>} : vector<2x32xf32>, vector<32x96xf32>, vector<2x96xf32> -> vector<2x96xf32>
    %652 = arith.addf %650, %651 : vector<2x96xf32>
    %653 = vector.extract_strided_slice %652 {offsets = [0, 0], sizes = [2, 32], strides = [1, 1]} : vector<2x96xf32> to vector<2x32xf32>
    %654 = arith.negf %653 : vector<2x32xf32>
    %655 = math.exp %654 : vector<2x32xf32>
    %cst_125 = arith.constant 1.000000e+00 : f32
    %656 = vector.broadcast %cst_125 : f32 to vector<2x32xf32>
    %657 = arith.addf %656, %655 : vector<2x32xf32>
    %658 = arith.divf %656, %657 : vector<2x32xf32>
    %659 = vector.extract_strided_slice %652 {offsets = [0, 32], sizes = [2, 32], strides = [1, 1]} : vector<2x96xf32> to vector<2x32xf32>
    %660 = arith.negf %659 : vector<2x32xf32>
    %661 = math.exp %660 : vector<2x32xf32>
    %cst_126 = arith.constant 1.000000e+00 : f32
    %662 = vector.broadcast %cst_126 : f32 to vector<2x32xf32>
    %663 = arith.addf %662, %661 : vector<2x32xf32>
    %664 = arith.divf %662, %663 : vector<2x32xf32>
    %665 = vector.extract_strided_slice %650 {offsets = [0, 64], sizes = [2, 32], strides = [1, 1]} : vector<2x96xf32> to vector<2x32xf32>
    %666 = vector.extract_strided_slice %651 {offsets = [0, 64], sizes = [2, 32], strides = [1, 1]} : vector<2x96xf32> to vector<2x32xf32>
    %667 = vector.broadcast %531 : vector<1x32xf32> to vector<2x32xf32>
    %668 = arith.addf %666, %667 : vector<2x32xf32>
    %669 = arith.mulf %658, %668 : vector<2x32xf32>
    %670 = arith.addf %665, %669 : vector<2x32xf32>
    %671 = math.tanh %670 : vector<2x32xf32>
    %cst_127 = arith.constant 1.000000e+00 : f32
    %672 = vector.broadcast %cst_127 : f32 to vector<2x32xf32>
    %673 = arith.subf %672, %664 : vector<2x32xf32>
    %674 = arith.mulf %673, %671 : vector<2x32xf32>
    %675 = arith.mulf %664, %639 : vector<2x32xf32>
    %676 = arith.addf %674, %675 : vector<2x32xf32>
    %677 = vector.broadcast %532 : vector<1x32xf32> to vector<2x32xf32>
    %678 = arith.mulf %676, %677 : vector<2x32xf32>
    %cst_128 = arith.constant dense<0.000000e+00> : vector<2xf32>
    %679 = vector.multi_reduction <add>, %678, %cst_128 [1] : vector<2x32xf32> to vector<2xf32>
    %680 = vector.shape_cast %679 : vector<2xf32> to vector<2x1xf32>
    %681 = vector.broadcast %533 : vector<1x1xf32> to vector<2x1xf32>
    %682 = arith.addf %680, %681 : vector<2x1xf32>
    %683 = tpu.iota {dimensions = array<i32: 1>} : vector<2x4xi32>
    %cst_129 = arith.constant 0.000000e+00 : f32
    %684 = vector.broadcast %cst_129 : f32 to vector<2x4xf32>
    %c0_i32_130 = arith.constant 0 : i32
    %685 = vector.broadcast %c0_i32_130 : i32 to vector<2x4xi32>
    %686 = arith.cmpi eq, %683, %685 : vector<2x4xi32>
    %687 = vector.shape_cast %571 : vector<2x1xf32> to vector<2x1xf32>
    %688 = vector.broadcast %687 : vector<2x1xf32> to vector<2x4xf32>
    %689 = arith.select %686, %688, %684 : vector<2x4xi1>, vector<2x4xf32>
    %c1_i32_131 = arith.constant 1 : i32
    %690 = vector.broadcast %c1_i32_131 : i32 to vector<2x4xi32>
    %691 = arith.cmpi eq, %683, %690 : vector<2x4xi32>
    %692 = vector.shape_cast %608 : vector<2x1xf32> to vector<2x1xf32>
    %693 = vector.broadcast %692 : vector<2x1xf32> to vector<2x4xf32>
    %694 = arith.select %691, %693, %689 : vector<2x4xi1>, vector<2x4xf32>
    %c2_i32_132 = arith.constant 2 : i32
    %695 = vector.broadcast %c2_i32_132 : i32 to vector<2x4xi32>
    %696 = arith.cmpi eq, %683, %695 : vector<2x4xi32>
    %697 = vector.shape_cast %645 : vector<2x1xf32> to vector<2x1xf32>
    %698 = vector.broadcast %697 : vector<2x1xf32> to vector<2x4xf32>
    %699 = arith.select %696, %698, %694 : vector<2x4xi1>, vector<2x4xf32>
    %c3_i32_133 = arith.constant 3 : i32
    %700 = vector.broadcast %c3_i32_133 : i32 to vector<2x4xi32>
    %701 = arith.cmpi eq, %683, %700 : vector<2x4xi32>
    %702 = vector.shape_cast %682 : vector<2x1xf32> to vector<2x1xf32>
    %703 = vector.broadcast %702 : vector<2x1xf32> to vector<2x4xf32>
    %704 = arith.select %701, %703, %699 : vector<2x4xi1>, vector<2x4xf32>
    %c0_134 = arith.constant 0 : index
    %c0_135 = arith.constant 0 : index
    %705 = vector.load %arg16[%c0_134, %c0_135] : memref<2x4xf32, #tpu.memory_space<vmem>>, vector<2x4xf32>
    tpu.vector_store %arg16[%c0_134, %c0_135], %704 {strides = array<i32>} : memref<2x4xf32, #tpu.memory_space<vmem>>, vector<2x4xf32>,
    return
  }
  func.func @transform_0(%arg0: i32) -> (i32, i32, i32) {
    %c0_i32 = arith.constant 0 : i32
    %c0_i32_0 = arith.constant 0 : i32
    %c0_i32_1 = arith.constant 0 : i32
    return %arg0, %c0_i32, %c0_i32_0 : i32, i32, i32
  }
  func.func @transform_1(%arg0: i32) -> (i32, i32) {
    %c0_i32 = arith.constant 0 : i32
    %c0_i32_0 = arith.constant 0 : i32
    return %arg0, %c0_i32 : i32, i32
  }
  func.func @transform_2(%arg0: i32) -> (i32, i32) {
    %c0_i32 = arith.constant 0 : i32
    %c0_i32_0 = arith.constant 0 : i32
    %c0_i32_1 = arith.constant 0 : i32
    return %c0_i32, %c0_i32_0 : i32, i32
  }
  func.func @transform_3(%arg0: i32) -> (i32, i32) {
    %c0_i32 = arith.constant 0 : i32
    %c0_i32_0 = arith.constant 0 : i32
    %c0_i32_1 = arith.constant 0 : i32
    return %c0_i32, %c0_i32_0 : i32, i32
  }
  func.func @transform_4(%arg0: i32) -> (i32, i32) {
    %c0_i32 = arith.constant 0 : i32
    %c0_i32_0 = arith.constant 0 : i32
    %c0_i32_1 = arith.constant 0 : i32
    return %c0_i32, %c0_i32_0 : i32, i32
  }
  func.func @transform_5(%arg0: i32) -> (i32, i32) {
    %c0_i32 = arith.constant 0 : i32
    %c0_i32_0 = arith.constant 0 : i32
    %c0_i32_1 = arith.constant 0 : i32
    return %c0_i32, %c0_i32_0 : i32, i32
  }
  func.func @transform_6(%arg0: i32) -> (i32, i32) {
    %c0_i32 = arith.constant 0 : i32
    %c0_i32_0 = arith.constant 0 : i32
    %c0_i32_1 = arith.constant 0 : i32
    return %c0_i32, %c0_i32_0 : i32, i32
  }
  func.func @transform_7(%arg0: i32) -> (i32, i32) {
    %c0_i32 = arith.constant 0 : i32
    %c0_i32_0 = arith.constant 0 : i32
    %c0_i32_1 = arith.constant 0 : i32
    return %c0_i32, %c0_i32_0 : i32, i32
  }
  func.func @transform_8(%arg0: i32) -> (i32, i32) {
    %c0_i32 = arith.constant 0 : i32
    %c0_i32_0 = arith.constant 0 : i32
    %c0_i32_1 = arith.constant 0 : i32
    return %c0_i32, %c0_i32_0 : i32, i32
  }
  func.func @transform_9(%arg0: i32) -> (i32, i32) {
    %c0_i32 = arith.constant 0 : i32
    %c0_i32_0 = arith.constant 0 : i32
    %c0_i32_1 = arith.constant 0 : i32
    return %c0_i32, %c0_i32_0 : i32, i32
  }
  func.func @transform_10(%arg0: i32) -> (i32, i32) {
    %c0_i32 = arith.constant 0 : i32
    %c0_i32_0 = arith.constant 0 : i32
    %c0_i32_1 = arith.constant 0 : i32
    return %c0_i32, %c0_i32_0 : i32, i32
  }
  func.func @transform_11(%arg0: i32) -> (i32, i32) {
    %c0_i32 = arith.constant 0 : i32
    %c0_i32_0 = arith.constant 0 : i32
    %c0_i32_1 = arith.constant 0 : i32
    return %c0_i32, %c0_i32_0 : i32, i32
  }
  func.func @transform_12(%arg0: i32) -> (i32, i32) {
    %c0_i32 = arith.constant 0 : i32
    %c0_i32_0 = arith.constant 0 : i32
    %c0_i32_1 = arith.constant 0 : i32
    return %c0_i32, %c0_i32_0 : i32, i32
  }
  func.func @transform_13(%arg0: i32) -> (i32, i32) {
    %c0_i32 = arith.constant 0 : i32
    %c0_i32_0 = arith.constant 0 : i32
    %c0_i32_1 = arith.constant 0 : i32
    return %c0_i32, %c0_i32_0 : i32, i32
  }
  func.func @transform_14(%arg0: i32) -> (i32, i32) {
    %c0_i32 = arith.constant 0 : i32
    %c0_i32_0 = arith.constant 0 : i32
    %c0_i32_1 = arith.constant 0 : i32
    return %c0_i32, %c0_i32_0 : i32, i32
  }
  func.func @transform_15(%arg0: i32) -> (i32, i32) {
    %c0_i32 = arith.constant 0 : i32
    %c0_i32_0 = arith.constant 0 : i32
    return %arg0, %c0_i32 : i32, i32
  }
  func.func @transform_16(%arg0: i32) -> (i32, i32) {
    %c0_i32 = arith.constant 0 : i32
    %c0_i32_0 = arith.constant 0 : i32
    return %arg0, %c0_i32 : i32, i32
  }
  func.func @transform_17(%arg0: i32) -> (i32, i32) {
    %c0_i32 = arith.constant 0 : i32
    %c0_i32_0 = arith.constant 0 : i32
    return %arg0, %c0_i32 : i32, i32
  }
}

</mosaic_0001>

<bundles_post_ra>
// kernel: input_encoder_v2_decoder.1
= control target key start
LH: loop header
LB: loop body
LE: loop exit
PB: predicated region body
PF: predicated region fallthrough
CT: control target
= control target key end

     0   :  { %s4062_s0 = inlined_call_operand.vmem [shape: f32[1,16,4], index: 0, kind: input, shape index: {}]   ;;  %s4063_s1 = inlined_call_operand.vmem [shape: f32[2,8], index: 1, kind: input, shape index: {}]   ;;  %s4064_s2 = inlined_call_operand.vmem [shape: f32[4,96], index: 2, kind: input, shape index: {}]   ;;  %s4065_s3 = inlined_call_operand.vmem [shape: f32[1,96], index: 3, kind: input, shape index: {}]   ;;  %s4066_s4 = inlined_call_operand.vmem [shape: f32[32,96], index: 4, kind: input, shape index: {}]   ;;  %s4067_s5 = inlined_call_operand.vmem [shape: f32[1,32], index: 5, kind: input, shape index: {}]   ;;  %s4068_s6 = inlined_call_operand.vmem [shape: f32[32,32], index: 6, kind: input, shape index: {}]   ;;  %s4069_s7 = inlined_call_operand.vmem [shape: f32[1,32], index: 7, kind: input, shape index: {}]   ;;  %s4070_s8 = inlined_call_operand.vmem [shape: f32[1,32], index: 8, kind: input, shape index: {}]   ;;  %s4071_s9 = inlined_call_operand.vmem [shape: f32[1,96], index: 9, kind: input, shape index: {}]   ;;  %s4072_s10 = inlined_call_operand.vmem [shape: f32[1,96], index: 10, kind: input, shape index: {}]   ;;  %s4073_s11 = inlined_call_operand.vmem [shape: f32[32,96], index: 11, kind: input, shape index: {}]   ;;  %s4074_s12 = inlined_call_operand.vmem [shape: f32[1,32], index: 12, kind: input, shape index: {}]   ;;  %s4075_s13 = inlined_call_operand.vmem [shape: f32[1,32], index: 13, kind: input, shape index: {}]   ;;  %s4076_s14 = inlined_call_operand.<no memory space> [shape: f32[1,1], index: 14, kind: input, shape index: {}]   ;;  %s4077_s15 = inlined_call_operand.hbm [shape: f32[2,4], index: 15, kind: output, shape index: {0}]   ;;  %s4078_s16 = inlined_call_operand.hbm [shape: f32[2,8], index: 16, kind: output, shape index: {1}]   ;;  %s4079_s17 = inlined_call_operand.hbm [shape: f32[2,8], index: 17, kind: output, shape index: {2}]  }
   0x1   :  { %4081 = sst [smem:[#allocation10_spill]] %s4062_s0  ;;  %v23_v0 = vstv %s4076_s14 }
   0x2   :  { %4082 = sst [smem:[#allocation11_spill]] %s4063_s1  ;;  %24 = vst [vmem:[#allocation2] sm:$0x1] %v23_v0 }
   0x3   :  { %25 = vsyncpa [#allocation4], 0  ;;  %v133_v1 = vld [vmem:[%s4066_s4] sm:$0xff]  ;;  %v134_v2 = vld [vmem:[%s4066_s4 + $0x8] sm:$0xff]  ;;  %v3258_v4 = vmov 0.0|0.0   ;;  %vm3259_vm0 = vmmov 0  }
   0x4   :  { %v135_v3 = vld [vmem:[%s4066_s4 + $0x10] sm:$0xff]  ;;  %2894 = vmatprep.subr.bf16.mxu0 %v3258_v4  ;;  %v3392_v5 = vpack.c.bf16 %v134_v2, %v133_v1  ;;  %v136_v6 = vld [vmem:[%s4066_s4 + $0x18] sm:$0xff]  ;;  %v3260_v7 = vmov 0.0   ;;  %s4083_s20 = sld [smem:[#allocation10_spill]]  ;;  %v2536_v9 = vld [vmem:[%s4067_s5] ss:$0 sm:$0xff] }
   0x5   :  { %2682 = vmatprep.mubr.msk.f32.mxu0 %vm3259_vm0, %v3260_v7  ;;  %v3261_v10 = vmov 1   ;;  %s3262_s23 = smov 64   ;;  %v3408_v11 = vpack.c.bf16 %v136_v6, %v135_v3 }
   0x6   :  { %3046 = vset.pattern.permute.xlu1 %v3261_v10  ;;  %231 = vrot.lane.b32.xlu0 %v2536_v9, %s3262_s23 }
   0x7   :  { %2896 = vmatpush3.bf16.msra.mxu0 %v3392_v5 }
   0xa   :  { %v57_v8 = vld [vmem:[%s4083_s20] sm:$0xff] }
   0xb   :  { %78 = vperm.xlu1 %3046, %v57_v8  }
   0xc   :  { %26 = vsyncpa [#allocation6], 0  ;;  %2897 = vmatprep.subr.bf16.mxu0 %v3258_v4  ;;  %v3263_v12 = vmov 0   ;;  %2900 = vmatprep.subr.bf16.mxu1 %v3258_v4  ;;  %v3264_v13 = vmov 2   ;;  %v3265_v14 = vmov 3   ;;  %v71_v19 = vlaneseq  ;;  %v138_v52 = vld [vmem:[%s4068_s6] sm:$0xff] }
   0xd   :  { %3045 = vset.pattern.permute.xlu0 %v3263_v12  ;;  %2693 = vmatprep.mubr.msk.f32.mxu1 %vm3259_vm0, %v3260_v7  ;;  %v60_v23 = vld [vmem:[%s4064_s2] sm:$0xf]  ;;  %v139_v53 = vld [vmem:[%s4068_s6 + $0x8] sm:$0xff]  ;;  %v140_v54 = vld [vmem:[%s4068_s6 + $0x10] sm:$0xff]  ;;  %s3266_s14 = smov 96   ;;  %vm145_vm1 = vcmask 261120  }
   0xe   :  { %63 = vperm.xlu0 %3045, %v57_v8   ;;  %2899 = vmatpush3.bf16.msra.mxu0 %v3408_v11  ;;  %v72_v20 = vshrl.u32 %v71_v19, 7  ;;  %v3450_v41 = vld [vmem:[%s4065_s3] ss:$0 sm:$0xff]  ;;  %v3467_v55 = vpack.c.bf16 %v139_v53, %v138_v52  ;;  %v141_v56 = vld [vmem:[%s4068_s6 + $0x18] sm:$0xff]  ;;  %vm343_vm2 = vcmask 254976   ;;  %s4084_s22 = sld [smem:[#allocation11_spill]] }
   0xf   :  { %3047 = vset.pattern.permute.xlu1 %v3264_v13  ;;  %2906 = vmatprep.subr.bf16.mxu0 %v3258_v4  ;;  %v3473_v57 = vpack.c.bf16 %v141_v56, %v140_v54  ;;  %s3267_s4 = smov 126   ;;  %s3268_s5 = smov 125   ;;  %vm1947_vm12 = vcmask 58368  }
  0x10   :  { %94 = vperm.xlu1 %3047, %v57_v8   ;;  %v87_v21 = vsub.s32 1, %v72_v20  ;;  %v73_v22 = vsub.s32 0, %v72_v20  ;;  %v103_v26 = vsub.s32 2, %v72_v20  ;;  %v119_v33 = vsub.s32 3, %v72_v20  ;;  %2902 = vmatpush3.bf16.msra.mxu1 %v3467_v55  ;;  %s3269_s2 = smov 123   ;;  %s3270_s24 = smov 127  }
  0x11   :  { %2683 = vmatmul.mubr.f32.vlgmr.msra.gmra.mrb[0].mxu0 %v3260_v7  ;;  %2903 = vmatprep.subr.bf16.mxu1 %v3258_v4  ;;  %s3271_s3 = smov 124   ;;  %s3272_s25 = smov 122  }
  0x12   :  { %2908 = vmatpush3.bf16.msra.mxu0 %v3392_v5  ;;  %2704 = vmatprep.mubr.msk.f32.mxu0 %vm3259_vm0, %v3260_v7  ;;  %v3435_v25 = vrot.slane %v60_v23, %v87_v21  ;;  %v3437_v27 = vrot.slane %v60_v23, %v73_v22  ;;  %v3440_v31 = vrot.slane %v60_v23, %v103_v26  ;;  %s3273_s26 = smov 121   ;;  %s3274_s27 = smov 1  }
  0x13   :  { %2909 = vmatprep.subr.bf16.mxu0 %v3258_v4  ;;  %v3444_v36 = vrot.slane %v60_v23, %v119_v33  ;;  %s3275_s28 = smov 2   ;;  %s3276_s29 = smov 3  }
  0x14   :  { %3048 = vset.pattern.permute.xlu1 %v3265_v14  ;;  %2905 = vmatpush3.bf16.msra.mxu1 %v3473_v57  ;;  %s3277_s0 = smov 4   ;;  %s3278_s30 = smov 5  }
  0x15   :  { %110 = vperm.xlu1 %3048, %v57_v8   ;;  %2912 = vmatprep.subr.bf16.mxu1 %v3258_v4  ;;  %s3279_s6 = smov 6   ;;  %s3280_s18 = smov 7  }
  0x16   :  { %2911 = vmatpush3.bf16.msra.mxu0 %v3408_v11  ;;  %s3285_s19 = smov 32  }
  0x17   :  { %2918 = vmatprep.subr.bf16.mxu0 %v3258_v4 }
  0x19   :  { %3049 = vset.pattern.permute.xlu1 %v3261_v10 }
  0x78   :  { %v3427_v15 = vpop.permute.xlu0 %231 }
  0x8a   :  { %v79_v24 = vpop.permute.xlu1 %78 }
  0x8b   :  { %v89_v30 = vmul.f32 %v3435_v25, %v79_v24 }
  0x8d   :  { %v64_v28 = vpop.permute.xlu0 %63 }
  0x8e   :  { %v75_v32 = vmul.f32 %v3437_v27, %v64_v28 }
  0x8f   :  { %v95_v29 = vpop.permute.xlu1 %94 }
  0x90   :  { %v105_v34 = vmul.f32 %v3440_v31, %v95_v29  ;;  %v91_v35 = vadd.f32 %v89_v30, %v75_v32 }
  0x92   :  { %v107_v38 = vadd.f32 %v105_v34, %v91_v35 }
  0x94   :  { %v111_v37 = vpop.permute.xlu1 %110 }
  0x95   :  { %v121_v39 = vmul.f32 %v3444_v36, %v111_v37 }
  0x97   :  { %v123_v40 = vadd.f32 %v121_v39, %v107_v38 }
  0x99   :  { %v3453_v42 = vadd.f32 %v3450_v41, %v123_v40 }
  0xe4   :  { %v215_v16 = vpop.f32.mrb[0].mxu0 }
  0xe5   :  { %v234_v17 = vadd.f32 %v3427_v15, %v215_v16  ;;  %v2684_v18 = vpop.f32.mrb[1].mxu0  ;;  %v219_v43 = vadd.f32 %v215_v16, %v3453_v42 }
  0xe7   :  { %236 = vrot.lane.b32.xlu0 %v234_v17, %s3262_s23  ;;  %v2535_v44 = vmul.f32 -1.442695, %v219_v43 }
  0xe9   :  { %3062 = vpow2.f32 %v2535_v44 }
  0xf3   :  { %v3063_v45 = vpop.eup %3062 }
  0xf4   :  { %v223_v46 = vadd.f32 1.0, %v3063_v45 }
  0xf6   :  { %3064 = vrcp.f32 %v223_v46 }
 0x100   :  { %v3065_v47 = vpop.eup %3064 }
 0x101   :  { %v246_v59 = vsub.f32 1.0, %v3065_v47  ;;  %v252_v61 = vmul.f32 0.0, %v3065_v47 }
 0x159   :  { %v237_v48 = vpop.permute.xlu0 %236 }
 0x15a   :  { %v239_v49 = vmul.f32 %v3065_v47, %v237_v48 }
 0x15c   :  { %241 = vrot.lane.b32.xlu1 %v239_v49, %s3262_s23 }
 0x1ce   :  { %v242_v50 = vpop.permute.xlu1 %241 }
 0x1cf   :  { %v244_v51 = vadd.f32 %v242_v50, %v3453_v42 }
 0x1d1   :  { %3066 = vtanh.f32 %v244_v51 }
 0x1db   :  { %v3067_v58 = vpop.eup %3066 }
 0x1dc   :  { %248 = vrot.lane.b32.xlu0 %v3067_v58, %s3266_s14 }
 0x24e   :  { %v249_v60 = vpop.permute.xlu0 %248 }
 0x24f   :  { %v251_v62 = vmul.f32 %v249_v60, %v246_v59 }
 0x251   :  { %v3479_v63 = vadd.f32 %v252_v61, %v251_v62 }
 0x253   :  { %261 = vrot.lane.b32.xlu1 %v3479_v63, %s3266_s14  ;;  %v471_v32 = vrot.slane %v3479_v63, 6 }
 0x2c5   :  { %v262_v0 = vpop.permute.xlu1 %261 }
 0x2c6   :  { %2694 = vmatmul.mubr.msk.f32.vlgmr.msra.gmra.mrb[0].mxu1 %vm145_vm1, %v262_v0  ;;  %2705 = vmatmul.mubr.msk.f32.vlgmr.msra.gmra.mrb[2].mxu0 %vm145_vm1, %v262_v0 }
 0x2c7   :  { %2914 = vmatpush3.bf16.msra.mxu1 %v3467_v55  ;;  %2920 = vmatpush3.bf16.msra.mxu0 %v3392_v5 }
 0x2c8   :  { %2915 = vmatprep.subr.bf16.mxu1 %v3258_v4  ;;  %2921 = vmatprep.subr.bf16.mxu0 %v3258_v4 }
 0x2c9   :  { %2715 = vmatprep.mubr.msk.f32.mxu1 %vm3259_vm0, %v3260_v7  ;;  %2726 = vmatprep.mubr.msk.f32.mxu0 %vm3259_vm0, %v3260_v7 }
 0x2cb   :  { %2917 = vmatpush3.bf16.msra.mxu1 %v3473_v57  ;;  %2923 = vmatpush3.bf16.msra.mxu0 %v3408_v11 }
 0x2cc   :  { %2924 = vmatprep.subr.bf16.mxu1 %v3258_v4  ;;  %2930 = vmatprep.subr.bf16.mxu0 %v3258_v4 }
 0x399   :  { %v3497_v1 = vpop.f32.mrb[0].mxu1  ;;  %v438_v2 = vpop.f32.mrb[2].mxu0 }
 0x39a   :  { %v452_v3 = vadd.f32 %v438_v2, %v3427_v15  ;;  %v2695_v6 = vpop.f32.mrb[1].mxu1  ;;  %v2706_v8 = vpop.f32.mrb[3].mxu0  ;;  %v443_v16 = vrot.slane %v438_v2, 6 }
 0x39c   :  { %v454_v9 = vrot.slane %v452_v3, 6  ;;  %v445_v17 = vadd.f32 %v443_v16, %v3453_v42 }
 0x39e   :  { %455 = vrot.lane.b32.xlu0 %v454_v9, %s3262_s23  ;;  %v2541_v18 = vmul.f32 -1.442695, %v445_v17 }
 0x3a0   :  { %3068 = vpow2.f32 %v2541_v18 }
 0x3aa   :  { %v3069_v20 = vpop.eup %3068 }
 0x3ab   :  { %v449_v21 = vadd.f32 1.0, %v3069_v20 }
 0x3ad   :  { %3070 = vrcp.f32 %v449_v21 }
 0x3b7   :  { %v3071_v22 = vpop.eup %3070 }
 0x3b8   :  { %v465_v30 = vsub.f32 1.0, %v3071_v22  ;;  %v473_v35 = vmul.f32 %v3071_v22, %v471_v32 }
 0x410   :  { %v456_v23 = vpop.permute.xlu0 %455 }
 0x411   :  { %v458_v24 = vmul.f32 %v3071_v22, %v456_v23 }
 0x413   :  { %460 = vrot.lane.b32.xlu1 %v458_v24, %s3262_s23 }
 0x485   :  { %v461_v26 = vpop.permute.xlu1 %460 }
 0x486   :  { %v463_v28 = vadd.f32 %v461_v26, %v3453_v42 }
 0x488   :  { %3072 = vtanh.f32 %v463_v28 }
 0x492   :  { %v3073_v29 = vpop.eup %3072 }
 0x493   :  { %467 = vrot.lane.b32.xlu0 %v3073_v29, %s3266_s14 }
 0x505   :  { %v468_v33 = vpop.permute.xlu0 %467 }
 0x506   :  { %v470_v34 = vmul.f32 %v468_v33, %v465_v30 }
 0x508   :  { %v474_v37 = vadd.f32 %v473_v35, %v470_v34 }
 0x50a   :  { %v476_v38 = vrot.slane %v474_v37, 2  ;;  %v695_v61 = vrot.slane %v474_v37, 6 }
 0x50c   :  { %477 = vrot.lane.b32.xlu1 %v476_v38, %s3266_s14  ;;  %v58_v38 = vld [vmem:[%s4083_s20 + $0x8] sm:$0xff] }
 0x57e   :  { %v3507_v39 = vpop.permute.xlu1 %477 }
 0x57f   :  { %2716 = vmatmul.mubr.msk.f32.vlgmr.msra.gmra.mrb[2].mxu1 %vm145_vm1, %v3507_v39  ;;  %2727 = vmatmul.mubr.msk.f32.vlgmr.msra.gmra.mrb[4].mxu0 %vm145_vm1, %v3507_v39 }
 0x580   :  { %2926 = vmatpush3.bf16.msra.mxu1 %v3467_v55  ;;  %2932 = vmatpush3.bf16.msra.mxu0 %v3392_v5 }
 0x581   :  { %2927 = vmatprep.subr.bf16.mxu1 %v3258_v4  ;;  %2933 = vmatprep.subr.bf16.mxu0 %v3258_v4 }
 0x582   :  { %2748 = vmatprep.mubr.msk.f32.mxu0 %vm3259_vm0, %v3260_v7  ;;  %2737 = vmatprep.mubr.msk.f32.mxu1 %vm3259_vm0, %v3260_v7 }
 0x584   :  { %2929 = vmatpush3.bf16.msra.mxu1 %v3473_v57  ;;  %2935 = vmatpush3.bf16.msra.mxu0 %v3408_v11 }
 0x585   :  { %2936 = vmatprep.subr.bf16.mxu1 %v3258_v4  ;;  %2942 = vmatprep.subr.bf16.mxu0 %v3258_v4 }
 0x652   :  { %v3525_v40 = vpop.f32.mrb[2].mxu1  ;;  %v662_v43 = vpop.f32.mrb[4].mxu0 }
 0x653   :  { %v676_v44 = vadd.f32 %v662_v43, %v3427_v15  ;;  %v2717_v45 = vpop.f32.mrb[3].mxu1  ;;  %v2728_v46 = vpop.f32.mrb[5].mxu0  ;;  %v667_v48 = vrot.slane %v662_v43, 4 }
 0x655   :  { %v678_v47 = vrot.slane %v676_v44, 4  ;;  %v669_v49 = vadd.f32 %v667_v48, %v3453_v42 }
 0x657   :  { %679 = vrot.lane.b32.xlu0 %v678_v47, %s3262_s23  ;;  %v2544_v50 = vmul.f32 -1.442695, %v669_v49 }
 0x659   :  { %3074 = vpow2.f32 %v2544_v50 }
 0x663   :  { %v3075_v51 = vpop.eup %3074 }
 0x664   :  { %v673_v52 = vadd.f32 1.0, %v3075_v51 }
 0x666   :  { %3076 = vrcp.f32 %v673_v52 }
 0x670   :  { %v3077_v53 = vpop.eup %3076 }
 0x671   :  { %v689_v62 = vsub.f32 1.0, %v3077_v53  ;;  %v697_v2 = vmul.f32 %v3077_v53, %v695_v61 }
 0x6c9   :  { %v680_v54 = vpop.permute.xlu0 %679 }
 0x6ca   :  { %v682_v56 = vmul.f32 %v3077_v53, %v680_v54 }
 0x6cc   :  { %684 = vrot.lane.b32.xlu1 %v682_v56, %s3262_s23 }
 0x73e   :  { %v685_v58 = vpop.permute.xlu1 %684 }
 0x73f   :  { %v687_v59 = vadd.f32 %v685_v58, %v3453_v42 }
 0x741   :  { %3078 = vtanh.f32 %v687_v59 }
 0x74b   :  { %v3079_v60 = vpop.eup %3078 }
 0x74c   :  { %691 = vrot.lane.b32.xlu0 %v3079_v60, %s3266_s14 }
 0x7be   :  { %v692_v0 = vpop.permute.xlu0 %691 }
 0x7bf   :  { %v694_v3 = vmul.f32 %v692_v0, %v689_v62 }
 0x7c1   :  { %v698_v6 = vadd.f32 %v697_v2, %v694_v3 }
 0x7c3   :  { %v700_v8 = vrot.slane %v698_v6, 4  ;;  %v919_v43 = vrot.slane %v698_v6, 6 }
 0x7c5   :  { %701 = vrot.lane.b32.xlu1 %v700_v8, %s3266_s14 }
 0x837   :  { %v3534_v9 = vpop.permute.xlu1 %701 }
 0x838   :  { %2738 = vmatmul.mubr.msk.f32.vlgmr.msra.gmra.mrb[4].mxu1 %vm145_vm1, %v3534_v9  ;;  %2749 = vmatmul.mubr.msk.f32.vlgmr.msra.gmra.mrb[6].mxu0 %vm145_vm1, %v3534_v9 }
 0x839   :  { %2938 = vmatpush3.bf16.msra.mxu1 %v3467_v55  ;;  %2944 = vmatpush3.bf16.msra.mxu0 %v3392_v5 }
 0x83a   :  { %2939 = vmatprep.subr.bf16.mxu1 %v3258_v4  ;;  %2945 = vmatprep.subr.bf16.mxu0 %v3258_v4 }
 0x83b   :  { %2770 = vmatprep.mubr.msk.f32.mxu0 %vm3259_vm0, %v3260_v7  ;;  %2759 = vmatprep.mubr.msk.f32.mxu1 %vm3259_vm0, %v3260_v7 }
 0x83d   :  { %2941 = vmatpush3.bf16.msra.mxu1 %v3473_v57  ;;  %2947 = vmatpush3.bf16.msra.mxu0 %v3408_v11 }
 0x83e   :  { %2948 = vmatprep.subr.bf16.mxu1 %v3258_v4  ;;  %2954 = vmatprep.subr.bf16.mxu0 %v3258_v4 }
 0x90b   :  { %v3552_v16 = vpop.f32.mrb[4].mxu1  ;;  %v886_v17 = vpop.f32.mrb[6].mxu0 }
 0x90c   :  { %v900_v18 = vadd.f32 %v886_v17, %v3427_v15  ;;  %v2739_v20 = vpop.f32.mrb[5].mxu1  ;;  %v2750_v21 = vpop.f32.mrb[7].mxu0  ;;  %v891_v23 = vrot.slane %v886_v17, 2 }
 0x90e   :  { %v902_v22 = vrot.slane %v900_v18, 2  ;;  %v893_v24 = vadd.f32 %v891_v23, %v3453_v42 }
 0x910   :  { %903 = vrot.lane.b32.xlu0 %v902_v22, %s3262_s23  ;;  %v2547_v26 = vmul.f32 -1.442695, %v893_v24 }
 0x912   :  { %3080 = vpow2.f32 %v2547_v26 }
 0x91c   :  { %v3081_v28 = vpop.eup %3080 }
 0x91d   :  { %v897_v29 = vadd.f32 1.0, %v3081_v28 }
 0x91f   :  { %3082 = vrcp.f32 %v897_v29 }
 0x929   :  { %v3083_v30 = vpop.eup %3082 }
 0x92a   :  { %v913_v44 = vsub.f32 1.0, %v3083_v30  ;;  %v921_v46 = vmul.f32 %v3083_v30, %v919_v43 }
 0x982   :  { %v904_v32 = vpop.permute.xlu0 %903 }
 0x983   :  { %v906_v33 = vmul.f32 %v3083_v30, %v904_v32 }
 0x985   :  { %908 = vrot.lane.b32.xlu1 %v906_v33, %s3262_s23 }
 0x9f7   :  { %v909_v34 = vpop.permute.xlu1 %908 }
 0x9f8   :  { %v911_v35 = vadd.f32 %v909_v34, %v3453_v42 }
 0x9fa   :  { %3084 = vtanh.f32 %v911_v35 }
 0xa04   :  { %v3085_v37 = vpop.eup %3084 }
 0xa05   :  { %915 = vrot.lane.b32.xlu0 %v3085_v37, %s3266_s14 }
 0xa09   :  { %68 = vperm.xlu0 %3045, %v58_v38  }
 0xa0d   :  { %3050 = vset.pattern.permute.xlu0 %v3264_v13 }
 0xa0e   :  { %98 = vperm.xlu0 %3050, %v58_v38  }
 0xa12   :  { %3052 = vset.pattern.permute.xlu0 %v3261_v10 }
 0xa77   :  { %v916_v45 = vpop.permute.xlu0 %915 }
 0xa78   :  { %v918_v47 = vmul.f32 %v916_v45, %v913_v44 }
 0xa7a   :  { %v922_v42 = vadd.f32 %v921_v46, %v918_v47 }
 0xa7c   :  { %v924_v48 = vrot.slane %v922_v42, 6 }
 0xa7e   :  { %925 = vrot.lane.b32.xlu1 %v924_v48, %s3266_s14 }
 0xa82   :  { %82 = vperm.xlu1 %3049, %v58_v38  }
 0xa86   :  { %3051 = vset.pattern.permute.xlu1 %v3265_v14 }
 0xa87   :  { %114 = vperm.xlu1 %3051, %v58_v38  }
 0xa88   :  { %v69_v53 = vpop.permute.xlu0 %68 }
 0xa89   :  { %v76_v59 = vmul.f32 %v3437_v27, %v69_v53 }
 0xa8b   :  { %3053 = vset.pattern.permute.xlu1 %v3264_v13 }
 0xa8d   :  { %v99_v58 = vpop.permute.xlu0 %98 }
 0xa8e   :  { %v106_v61 = vmul.f32 %v3440_v31, %v99_v58 }
 0xaf0   :  { %v3568_v49 = vpop.permute.xlu1 %925 }
 0xaf1   :  { %2760 = vmatmul.mubr.msk.f32.vlgmr.msra.gmra.mrb[6].mxu1 %vm145_vm1, %v3568_v49  ;;  %2771 = vmatmul.mubr.msk.f32.vlgmr.msra.gmra.mrb[8].mxu0 %vm145_vm1, %v3568_v49 }
 0xaf2   :  { %2950 = vmatpush3.bf16.msra.mxu1 %v3467_v55  ;;  %2956 = vmatpush3.bf16.msra.mxu0 %v3392_v5 }
 0xaf3   :  { %2951 = vmatprep.subr.bf16.mxu1 %v3258_v4  ;;  %2957 = vmatprep.subr.bf16.mxu0 %v3258_v4 }
 0xaf4   :  { %2792 = vmatprep.mubr.msk.f32.mxu0 %vm3259_vm0, %v3260_v7  ;;  %2781 = vmatprep.mubr.msk.f32.mxu1 %vm3259_vm0, %v3260_v7 }
 0xaf6   :  { %2953 = vmatpush3.bf16.msra.mxu1 %v3473_v57  ;;  %2959 = vmatpush3.bf16.msra.mxu0 %v3408_v11 }
 0xaf7   :  { %2960 = vmatprep.subr.bf16.mxu1 %v3258_v4  ;;  %2966 = vmatprep.subr.bf16.mxu0 %v3258_v4 }
 0xb01   :  { %v83_v54 = vpop.permute.xlu1 %82 }
 0xb02   :  { %v90_v56 = vmul.f32 %v3435_v25, %v83_v54 }
 0xb04   :  { %v92_v60 = vadd.f32 %v90_v56, %v76_v59 }
 0xb06   :  { %v115_v62 = vpop.permute.xlu1 %114  ;;  %v108_v0 = vadd.f32 %v106_v61, %v92_v60 }
 0xb07   :  { %v122_v2 = vmul.f32 %v3444_v36, %v115_v62 }
 0xb09   :  { %v124_v3 = vadd.f32 %v122_v2, %v108_v0 }
 0xb0b   :  { %v3595_v6 = vadd.f32 %v3450_v41, %v124_v3 }
 0xbc4   :  { %v3586_v10 = vpop.f32.mrb[6].mxu1  ;;  %v1110_v13 = vpop.f32.mrb[8].mxu0 }
 0xbc5   :  { %v1121_v50 = vadd.f32 %v1110_v13, %v3427_v15  ;;  %v2761_v51 = vpop.f32.mrb[7].mxu1  ;;  %v2772_v52 = vpop.f32.mrb[9].mxu0  ;;  %v1114_v8 = vadd.f32 %v1110_v13, %v3595_v6 }
 0xbc7   :  { %1123 = vrot.lane.b32.xlu1 %v1121_v50, %s3262_s23  ;;  %v2550_v17 = vmul.f32 -1.442695, %v1114_v8 }
 0xbc9   :  { %3086 = vpow2.f32 %v2550_v17 }
 0xbd3   :  { %v3087_v18 = vpop.eup %3086 }
 0xbd4   :  { %v1118_v25 = vadd.f32 1.0, %v3087_v18 }
 0xbd6   :  { %3088 = vrcp.f32 %v1118_v25 }
 0xbe0   :  { %v3089_v20 = vpop.eup %3088 }
 0xbe1   :  { %v1133_v41 = vsub.f32 1.0, %v3089_v20  ;;  %v1140_v24 = vmul.f32 %v3089_v20, %v924_v48 }
 0xc39   :  { %v1124_v27 = vpop.permute.xlu1 %1123 }
 0xc3a   :  { %v1126_v21 = vmul.f32 %v3089_v20, %v1124_v27 }
 0xc3c   :  { %1128 = vrot.lane.b32.xlu0 %v1126_v21, %s3262_s23 }
 0xcae   :  { %v1129_v31 = vpop.permute.xlu0 %1128 }
 0xcaf   :  { %v1131_v22 = vadd.f32 %v1129_v31, %v3595_v6 }
 0xcb1   :  { %3090 = vtanh.f32 %v1131_v22 }
 0xcbb   :  { %v3091_v36 = vpop.eup %3090 }
 0xcbc   :  { %1135 = vrot.lane.b32.xlu1 %v3091_v36, %s3266_s14 }
 0xd2e   :  { %v1136_v23 = vpop.permute.xlu1 %1135 }
 0xd2f   :  { %v1138_v26 = vmul.f32 %v1136_v23, %v1133_v41 }
 0xd31   :  { %v3601_v28 = vadd.f32 %v1140_v24, %v1138_v26 }
 0xd33   :  { %1143 = vrot.lane.b32.xlu0 %v3601_v28, %s3266_s14  ;;  %v1356_v53 = vrot.slane %v3601_v28, 6 }
 0xda5   :  { %v1144_v29 = vpop.permute.xlu0 %1143 }
 0xda6   :  { %2782 = vmatmul.mubr.msk.f32.vlgmr.msra.gmra.mrb[8].mxu1 %vm145_vm1, %v1144_v29  ;;  %2793 = vmatmul.mubr.msk.f32.vlgmr.msra.gmra.mrb[10].mxu0 %vm145_vm1, %v1144_v29 }
 0xda7   :  { %2962 = vmatpush3.bf16.msra.mxu1 %v3467_v55  ;;  %2968 = vmatpush3.bf16.msra.mxu0 %v3392_v5 }
 0xda8   :  { %2963 = vmatprep.subr.bf16.mxu1 %v3258_v4  ;;  %2969 = vmatprep.subr.bf16.mxu0 %v3258_v4 }
 0xda9   :  { %2814 = vmatprep.mubr.msk.f32.mxu0 %vm3259_vm0, %v3260_v7  ;;  %2803 = vmatprep.mubr.msk.f32.mxu1 %vm3259_vm0, %v3260_v7 }
 0xdab   :  { %2965 = vmatpush3.bf16.msra.mxu1 %v3473_v57  ;;  %2971 = vmatpush3.bf16.msra.mxu0 %v3408_v11 }
 0xdac   :  { %2972 = vmatprep.subr.bf16.mxu1 %v3258_v4  ;;  %2978 = vmatprep.subr.bf16.mxu0 %v3258_v4 }
 0xe79   :  { %v3619_v30 = vpop.f32.mrb[8].mxu1  ;;  %v1323_v32 = vpop.f32.mrb[10].mxu0 }
 0xe7a   :  { %v1337_v33 = vadd.f32 %v1323_v32, %v3427_v15  ;;  %v2783_v34 = vpop.f32.mrb[9].mxu1  ;;  %v2794_v35 = vpop.f32.mrb[11].mxu0  ;;  %v1328_v38 = vrot.slane %v1323_v32, 6 }
 0xe7c   :  { %v1339_v37 = vrot.slane %v1337_v33, 6  ;;  %v1330_v43 = vadd.f32 %v1328_v38, %v3595_v6 }
 0xe7e   :  { %1340 = vrot.lane.b32.xlu1 %v1339_v37, %s3262_s23  ;;  %v2553_v44 = vmul.f32 -1.442695, %v1330_v43 }
 0xe80   :  { %3092 = vpow2.f32 %v2553_v44 }
 0xe8a   :  { %v3093_v45 = vpop.eup %3092 }
 0xe8b   :  { %v1334_v46 = vadd.f32 1.0, %v3093_v45 }
 0xe8d   :  { %3094 = vrcp.f32 %v1334_v46 }
 0xe97   :  { %v3095_v47 = vpop.eup %3094 }
 0xe98   :  { %v1350_v52 = vsub.f32 1.0, %v3095_v47  ;;  %v1358_v56 = vmul.f32 %v3095_v47, %v1356_v53 }
 0xef0   :  { %v1341_v42 = vpop.permute.xlu1 %1340 }
 0xef1   :  { %v1343_v48 = vmul.f32 %v3095_v47, %v1341_v42 }
 0xef3   :  { %1345 = vrot.lane.b32.xlu0 %v1343_v48, %s3262_s23 }
 0xf65   :  { %v1346_v13 = vpop.permute.xlu0 %1345 }
 0xf66   :  { %v1348_v50 = vadd.f32 %v1346_v13, %v3595_v6 }
 0xf68   :  { %3096 = vtanh.f32 %v1348_v50 }
 0xf72   :  { %v3097_v51 = vpop.eup %3096 }
 0xf73   :  { %1352 = vrot.lane.b32.xlu1 %v3097_v51, %s3266_s14 }
 0xfe5   :  { %v1353_v54 = vpop.permute.xlu1 %1352 }
 0xfe6   :  { %v1355_v58 = vmul.f32 %v1353_v54, %v1350_v52  ;;  %v3682_v54 = vld [vmem:[%s4069_s7] ss:$0 sm:$0xff] }
 0xfe8   :  { %v1359_v59 = vadd.f32 %v1358_v56, %v1355_v58  ;;  %v548_v56 = vadd.f32 %v3682_v54, %v3525_v40  ;;  %v1214_v58 = vadd.f32 %v3682_v54, %v3619_v30 }
 0xfea   :  { %v1361_v60 = vrot.slane %v1359_v59, 2  ;;  %v1580_v23 = vrot.slane %v1359_v59, 6 }
 0xfec   :  { %1362 = vrot.lane.b32.xlu0 %v1361_v60, %s3266_s14 }
0x105e   :  { %v3629_v61 = vpop.permute.xlu0 %1362 }
0x105f   :  { %2804 = vmatmul.mubr.msk.f32.vlgmr.msra.gmra.mrb[10].mxu1 %vm145_vm1, %v3629_v61  ;;  %2815 = vmatmul.mubr.msk.f32.vlgmr.msra.gmra.mrb[12].mxu0 %vm145_vm1, %v3629_v61 }
0x1060   :  { %2974 = vmatpush3.bf16.msra.mxu1 %v3467_v55  ;;  %2980 = vmatpush3.bf16.msra.mxu0 %v3392_v5 }
0x1061   :  { %2975 = vmatprep.subr.bf16.mxu1 %v3258_v4  ;;  %2981 = vmatprep.subr.bf16.mxu0 %v3258_v4 }
0x1062   :  { %2836 = vmatprep.mubr.msk.f32.mxu0 %vm3259_vm0, %v3260_v7  ;;  %2825 = vmatprep.mubr.msk.f32.mxu1 %vm3259_vm0, %v3260_v7 }
0x1064   :  { %2977 = vmatpush3.bf16.msra.mxu1 %v3473_v57  ;;  %2983 = vmatpush3.bf16.msra.mxu0 %v3408_v11 }
0x1065   :  { %2984 = vmatprep.subr.bf16.mxu1 %v3258_v4  ;;  %2990 = vmatprep.subr.bf16.mxu0 %v3258_v4 }
0x1132   :  { %v3647_v62 = vpop.f32.mrb[10].mxu1  ;;  %v1547_v5 = vpop.f32.mrb[12].mxu0 }
0x1133   :  { %v1561_v0 = vadd.f32 %v1547_v5, %v3427_v15  ;;  %v2805_v2 = vpop.f32.mrb[11].mxu1  ;;  %v2816_v3 = vpop.f32.mrb[13].mxu0  ;;  %v1552_v17 = vrot.slane %v1547_v5, 4  ;;  %v3694_v5 = vld [vmem:[%s4070_s8] ss:$0 sm:$0xff] }
0x1135   :  { %v1563_v8 = vrot.slane %v1561_v0, 4  ;;  %v1554_v18 = vadd.f32 %v1552_v17, %v3595_v6 }
0x1137   :  { %1564 = vrot.lane.b32.xlu1 %v1563_v8, %s3262_s23  ;;  %v2556_v25 = vmul.f32 -1.442695, %v1554_v18 }
0x1139   :  { %3098 = vpow2.f32 %v2556_v25 }
0x1143   :  { %v3099_v11 = vpop.eup %3098 }
0x1144   :  { %v1558_v20 = vadd.f32 1.0, %v3099_v11 }
0x1146   :  { %3100 = vrcp.f32 %v1558_v20 }
0x1150   :  { %v3101_v27 = vpop.eup %3100 }
0x1151   :  { %v1574_v24 = vsub.f32 1.0, %v3101_v27  ;;  %v1582_v29 = vmul.f32 %v3101_v27, %v1580_v23  ;;  %v772_v23 = vadd.f32 %v3682_v54, %v3552_v16 }
0x11a9   :  { %v1565_v21 = vpop.permute.xlu1 %1564 }
0x11aa   :  { %v1567_v31 = vmul.f32 %v3101_v27, %v1565_v21 }
0x11ac   :  { %1569 = vrot.lane.b32.xlu0 %v1567_v31, %s3262_s23 }
0x121e   :  { %v1570_v22 = vpop.permute.xlu0 %1569 }
0x121f   :  { %v1572_v36 = vadd.f32 %v1570_v22, %v3595_v6 }
0x1221   :  { %3102 = vtanh.f32 %v1572_v36 }
0x122b   :  { %v3103_v41 = vpop.eup %3102 }
0x122c   :  { %1576 = vrot.lane.b32.xlu1 %v3103_v41, %s3266_s14 }
0x129e   :  { %v1577_v26 = vpop.permute.xlu1 %1576 }
0x129f   :  { %v1579_v32 = vmul.f32 %v1577_v26, %v1574_v24  ;;  %v996_v24 = vadd.f32 %v3682_v54, %v3586_v10  ;;  %v1433_v26 = vadd.f32 %v3682_v54, %v3647_v62 }
0x12a1   :  { %v3655_v33 = vadd.f32 %v1582_v29, %v1579_v32 }
0x12a3   :  { %v1585_v34 = vrot.slane %v3655_v33, 4  ;;  %v1804_v20 = vrot.slane %v3655_v33, 6 }
0x12a5   :  { %1586 = vrot.lane.b32.xlu0 %v1585_v34, %s3266_s14 }
0x1317   :  { %v3659_v35 = vpop.permute.xlu0 %1586 }
0x1318   :  { %2826 = vmatmul.mubr.msk.f32.vlgmr.msra.gmra.mrb[12].mxu1 %vm145_vm1, %v3659_v35  ;;  %2837 = vmatmul.mubr.msk.f32.vlgmr.msra.gmra.mrb[14].mxu0 %vm145_vm1, %v3659_v35 }
0x1319   :  { %2986 = vmatpush3.bf16.msra.mxu1 %v3467_v55  ;;  %2847 = vmatprep.mubr.msk.f32.mxu1 %vm3259_vm0, %v3260_v7 }
0x131a   :  { %2987 = vmatprep.subr.bf16.mxu1 %v3258_v4  ;;  %2858 = vmatprep.mubr.msk.f32.mxu0 %vm3259_vm0, %v3260_v7 }
0x131d   :  { %2989 = vmatpush3.bf16.msra.mxu1 %v3473_v57 }
0x131e   :  { %2996 = vmatprep.subr.bf16.mxu1 %v3258_v4 }
0x13eb   :  { %v1656_v37 = vpop.f32.mrb[12].mxu1  ;;  %v1771_v38 = vpop.f32.mrb[14].mxu0 }
0x13ec   :  { %v1785_v43 = vadd.f32 %v1771_v38, %v3427_v15  ;;  %v2827_v44 = vpop.f32.mrb[13].mxu1  ;;  %v2838_v45 = vpop.f32.mrb[15].mxu0  ;;  %v1776_v55 = vrot.slane %v1771_v38, 2  ;;  %v1657_v59 = vadd.f32 %v3682_v54, %v1656_v37 }
0x13ee   :  { %v1787_v46 = vrot.slane %v1785_v43, 2  ;;  %v1778_v47 = vadd.f32 %v1776_v55, %v3595_v6  ;;  %v3725_v55 = vand.u32 127, %v71_v19 }
0x13f0   :  { %1788 = vrot.lane.b32.xlu1 %v1787_v46, %s3262_s23  ;;  %v2559_v42 = vmul.f32 -1.442695, %v1778_v47  ;;  %vm1931_vm3 = vcmp.eq.s32.totalorder %v3725_v55, 0  ;;  %vm1933_vm4 = vcmp.eq.s32.totalorder %v3725_v55, 1  ;;  %vm1935_vm5 = vcmp.eq.s32.totalorder %v3725_v55, 2 }
0x13f1   :  { %vm1937_vm7 = vcmp.eq.s32.totalorder %v3725_v55, 3  ;;  %vm1939_vm8 = vcmp.eq.s32.totalorder %v3725_v55, 4  ;;  %vm1941_vm9 = vcmp.eq.s32.totalorder %v3725_v55, 5  ;;  %vm1943_vm10 = vcmp.eq.s32.totalorder %v3725_v55, 6 }
0x13f2   :  { %3104 = vpow2.f32 %v2559_v42  ;;  %v3731_v42 = vld [vmem:[%s4084_s22] sm:$0x3]  ;;  %vm1945_vm11 = vcmp.eq.s32.totalorder %v3725_v55, 7 }
0x13f3   :  { %vm347_vm6 = vcmp.gt.f32.partialorder %v3731_v42, 0.0 }
0x13fc   :  { %v3105_v48 = vpop.eup %3104 }
0x13fd   :  { %v1782_v13 = vadd.f32 1.0, %v3105_v48 }
0x13ff   :  { %3106 = vrcp.f32 %v1782_v13 }
0x1409   :  { %v3107_v57 = vpop.eup %3106 }
0x140a   :  { %v1798_v27 = vsub.f32 1.0, %v3107_v57  ;;  %v1806_v31 = vmul.f32 %v3107_v57, %v1804_v20 }
0x1462   :  { %v1789_v50 = vpop.permute.xlu1 %1788 }
0x1463   :  { %v1791_v51 = vmul.f32 %v3107_v57, %v1789_v50 }
0x1465   :  { %1793 = vrot.lane.b32.xlu0 %v1791_v51, %s3262_s23 }
0x14d7   :  { %v1794_v52 = vpop.permute.xlu0 %1793 }
0x14d8   :  { %v1796_v15 = vadd.f32 %v1794_v52, %v3595_v6  ;;  %v332_v6 = vadd.f32 %v3682_v54, %v3497_v1 }
0x14da   :  { %3108 = vtanh.f32 %v1796_v15 }
0x14db   :  { %3110 = vtanh.f32 %v548_v56 }
0x14dc   :  { %3112 = vtanh.f32 %v1214_v58 }
0x14dd   :  { %3114 = vtanh.f32 %v1657_v59 }
0x14de   :  { %3116 = vtanh.f32 %v332_v6 }
0x14df   :  { %3118 = vtanh.f32 %v772_v23 }
0x14e0   :  { %3120 = vtanh.f32 %v996_v24 }
0x14e1   :  { %3122 = vtanh.f32 %v1433_v26 }
0x14e4   :  { %v3109_v53 = vpop.eup %3108 }
0x14e5   :  { %1800 = vrot.lane.b32.xlu1 %v3109_v53, %s3266_s14  ;;  %v3111_v60 = vpop.eup %3110 }
0x14e6   :  { %v552_v40 = vmul.f32 %v3111_v60, %v3694_v5  ;;  %v3113_v0 = vpop.eup %3112 }
0x14e7   :  { %v1218_v2 = vmul.f32 %v3113_v0, %v3694_v5  ;;  %v3115_v3 = vpop.eup %3114 }
0x14e8   :  { %v553_v30 = vsel %vm343_vm2, %v552_v40, 0.0  ;;  %v1661_v8 = vmul.f32 %v3115_v3, %v3694_v5  ;;  %v3117_v17 = vpop.eup %3116 }
0x14e9   :  { %v1219_v1 = vsel %vm343_vm2, %v1218_v2, 0.0  ;;  %v342_v25 = vmul.f32 %v3117_v17, %v3694_v5  ;;  %v3119_v29 = vpop.eup %3118 }
0x14ea   :  { %v1662_v18 = vsel %vm343_vm2, %v1661_v8, 0.0  ;;  %v776_v32 = vmul.f32 %v3119_v29, %v3694_v5  ;;  %v3121_v33 = vpop.eup %3120 }
0x14eb   :  { %v344_v11 = vsel %vm343_vm2, %v342_v25, 0.0  ;;  %v1000_v37 = vmul.f32 %v3121_v33, %v3694_v5  ;;  %v3123_v38 = vpop.eup %3122 }
0x14ec   :  { %v777_v34 = vsel %vm343_vm2, %v776_v32, 0.0  ;;  %v1437_v43 = vmul.f32 %v3123_v38, %v3694_v5 }
0x14ed   :  { %v1001_v16 = vsel %vm343_vm2, %v1000_v37, 0.0 }
0x14ee   :  { %v1438_v10 = vsel %vm343_vm2, %v1437_v43, 0.0 }
0x1509   :  { %554 = vadd.xlane.f32.xlu1 %v553_v30 }
0x150d   :  { %1220 = vadd.xlane.f32.xlu1 %v1219_v1 }
0x1511   :  { %1663 = vadd.xlane.f32.xlu1 %v1662_v18 }
0x1515   :  { %345 = vadd.xlane.f32.xlu1 %v344_v11 }
0x1557   :  { %v1801_v21 = vpop.permute.xlu1 %1800 }
0x1558   :  { %v1803_v22 = vmul.f32 %v1801_v21, %v1798_v27 }
0x155a   :  { %v1807_v36 = vadd.f32 %v1806_v31, %v1803_v22 }
0x155c   :  { %v1809_v41 = vrot.slane %v1807_v36, 6 }
0x155e   :  { %1810 = vrot.lane.b32.xlu0 %v1809_v41, %s3266_s14 }
0x157d   :  { %778 = vadd.xlane.f32.xlu0 %v777_v34 }
0x1581   :  { %1002 = vadd.xlane.f32.xlu0 %v1001_v16 }
0x1585   :  { %1439 = vadd.xlane.f32.xlu0 %v1438_v10 }
0x1596   :  { %v555_v44 = vpop.xlane.xlu1 %554 }
0x1597   :  { %v556_v1 = vsel %vm347_vm6, %v555_v44, -1e+30 }
0x159a   :  { %v1221_v45 = vpop.xlane.xlu1 %1220 }
0x159b   :  { %v3774_v8 = vsel %vm347_vm6, %v1221_v45, -1e+30 }
0x159e   :  { %v1664_v46 = vpop.xlane.xlu1 %1663 }
0x15a2   :  { %v346_v47 = vpop.xlane.xlu1 %345 }
0x15a3   :  { %v1932_v48 = vsel %vm1931_vm3, %v346_v47, 0.0 }
0x15a4   :  { %v1934_v19 = vsel %vm1933_vm4, %v555_v44, %v1932_v48 }
0x15d0   :  { %v3718_v62 = vpop.permute.xlu0 %1810 }
0x15d1   :  { %2848 = vmatmul.mubr.msk.f32.vlgmr.msra.gmra.mrb[14].mxu1 %vm145_vm1, %v3718_v62 }
0x15d2   :  { %2869 = vmatprep.mubr.msk.f32.mxu1 %vm3259_vm0, %v3260_v7 }
0x160a   :  { %v779_v13 = vpop.xlane.xlu0 %778 }
0x160b   :  { %v1936_v57 = vsel %vm1935_vm5, %v779_v13, %v1934_v19  ;;  %v3744_v50 = vsel %vm347_vm6, %v779_v13, -1e+30 }
0x160c   :  { %782 = vrot.lane.b32.xlu1 %v3744_v50, %s3267_s4 }
0x160e   :  { %v1003_v51 = vpop.xlane.xlu0 %1002 }
0x160f   :  { %v1938_v52 = vsel %vm1937_vm7, %v1003_v51, %v1936_v57  ;;  %v3754_v15 = vsel %vm347_vm6, %v1003_v51, -1e+30 }
0x1610   :  { %1006 = vrot.lane.b32.xlu1 %v3754_v15, %s3268_s5  ;;  %v1940_v53 = vsel %vm1939_vm8, %v1221_v45, %v1938_v52 }
0x1612   :  { %v1440_v56 = vpop.xlane.xlu0 %1439 }
0x1613   :  { %v1942_v58 = vsel %vm1941_vm9, %v1440_v56, %v1940_v53  ;;  %v3762_v59 = vsel %vm347_vm6, %v1440_v56, -1e+30 }
0x1614   :  { %1443 = vrot.lane.b32.xlu1 %v3762_v59, %s3269_s2  ;;  %v1944_v6 = vsel %vm1943_vm10, %v1664_v46, %v1942_v58 }
0x167e   :  { %v783_v17 = vpop.permute.xlu1 %782 }
0x1682   :  { %v1007_v31 = vpop.permute.xlu1 %1006 }
0x1686   :  { %v1444_v29 = vpop.permute.xlu1 %1443 }
0x16a4   :  { %v1880_v60 = vpop.f32.mrb[14].mxu1 }
0x16a5   :  { %v1881_v40 = vadd.f32 %v3682_v54, %v1880_v60  ;;  %v2849_v0 = vpop.f32.mrb[15].mxu1  ;;  %v3780_v54 = vsel %vm347_vm6, %v1664_v46, -1e+30 }
0x16a7   :  { %3124 = vtanh.f32 %v1881_v40 }
0x16b1   :  { %v3125_v30 = vpop.eup %3124 }
0x16b2   :  { %v1885_v2 = vmul.f32 %v3125_v30, %v3694_v5  ;;  %v3787_v5 = vsel %vm347_vm6, %v346_v47, -1e+30 }
0x16b3   :  { %v3800_v20 = vmax.f32 %v3787_v5, -1e+30 }
0x16b4   :  { %v1886_v3 = vsel %vm343_vm2, %v1885_v2, 0.0 }
0x16b5   :  { %1887 = vadd.xlane.f32.xlu0 %v1886_v3 }
0x16cb   :  { %558 = vrot.lane.b32.xlu0 %v556_v1, %s3270_s24 }
0x16cf   :  { %1224 = vrot.lane.b32.xlu0 %v3774_v8, %s3271_s3 }
0x16d3   :  { %1667 = vrot.lane.b32.xlu0 %v3780_v54, %s3272_s25 }
0x1742   :  { %v1888_v18 = vpop.xlane.xlu0 %1887 }
0x1743   :  { %v3789_v25 = vsel %vm1945_vm11, %v1888_v18, %v1944_v6  ;;  %v3793_v11 = vsel %vm347_vm6, %v1888_v18, -1e+30 }
0x1744   :  { %1891 = vrot.lane.b32.xlu1 %v3793_v11, %s3273_s26  ;;  %1948 = vst.msk [vmem:[#allocation5] sm:$0x3] %vm1947_vm12, %v3789_v25 }
0x1746   :  { %v559_v27 = vpop.permute.xlu0 %558 }
0x1747   :  { %v3803_v21 = vmax.f32 %v3800_v20, %v559_v27 }
0x1749   :  { %v3806_v22 = vmax.f32 %v3803_v21, %v783_v17  ;;  %566 = vrot.lane.b32.xlu0 %v3803_v21, %s3274_s27 }
0x174a   :  { %v1225_v36 = vpop.permute.xlu0 %1224 }
0x174b   :  { %v786_v41 = vsub.f32 %v3803_v21, %v3806_v22  ;;  %v3812_v23 = vmax.f32 %v3806_v22, %v1007_v31  ;;  %790 = vrot.lane.b32.xlu1 %v3806_v22, %s3275_s28 }
0x174d   :  { %v3816_v24 = vmax.f32 %v3812_v23, %v1225_v36  ;;  %1014 = vrot.lane.b32.xlu0 %v3812_v23, %s3276_s29  ;;  %v1010_v26 = vsub.f32 %v3806_v22, %v3812_v23  ;;  %v3281_v36 = vmov 5  }
0x174e   :  { %v1668_v34 = vpop.permute.xlu0 %1667 }
0x174f   :  { %v1228_v32 = vsub.f32 %v3812_v23, %v3816_v24  ;;  %v3824_v33 = vmax.f32 %v3816_v24, %v1444_v29  ;;  %1232 = vrot.lane.b32.xlu1 %v3816_v24, %s3277_s0  ;;  %v787_v29 = vmul.f32 1.442695, %v786_v41  ;;  %v353_v41 = vsub.f32 %v3787_v5, %v3800_v20 }
0x1751   :  { %v3828_v37 = vmax.f32 %v3824_v33, %v1668_v34  ;;  %1451 = vrot.lane.b32.xlu0 %v3824_v33, %s3278_s30  ;;  %v1447_v38 = vsub.f32 %v3816_v24, %v3824_v33 }
0x1753   :  { %1675 = vrot.lane.b32.xlu1 %v3828_v37, %s3279_s6  ;;  %v1448_v22 = vmul.f32 1.442695, %v1447_v38 }
0x17b6   :  { %v1892_v16 = vpop.permute.xlu1 %1891 }
0x17b7   :  { %v3835_v43 = vmax.f32 %v3828_v37, %v1892_v16  ;;  %v3282_v16 = vmov 6  }
0x17b9   :  { %1899 = vrot.lane.b32.xlu0 %v3835_v43, %s3280_s18  ;;  %v1895_v24 = vsub.f32 %v3828_v37, %v3835_v43 }
0x17bb   :  { %v567_v10 = vpop.permute.xlu0 %566 }
0x17bc   :  { %v569_v44 = vsub.f32 %v556_v1, %v567_v10 }
0x17bd   :  { %v791_v45 = vpop.permute.xlu1 %790 }
0x17be   :  { %v570_v46 = vmul.f32 1.442695, %v569_v44  ;;  %v793_v47 = vsub.f32 %v3744_v50, %v791_v45  ;;  %v3283_v45 = vmov 4  }
0x17bf   :  { %v1015_v48 = vpop.permute.xlu0 %1014 }
0x17c0   :  { %3126 = vpow2.f32 %v570_v46  ;;  %v794_v13 = vmul.f32 1.442695, %v793_v47  ;;  %v1017_v19 = vsub.f32 %v3754_v15, %v1015_v48  ;;  %v354_v46 = vmul.f32 1.442695, %v353_v41 }
0x17c1   :  { %v1233_v57 = vpop.permute.xlu1 %1232  ;;  %v562_v47 = vsub.f32 %v3800_v20, %v3803_v21 }
0x17c2   :  { %3128 = vpow2.f32 %v794_v13  ;;  %v1018_v51 = vmul.f32 1.442695, %v1017_v19  ;;  %v1235_v52 = vsub.f32 %v3774_v8, %v1233_v57  ;;  %v350_v8 = vsub.f32 -1e+30, %v3800_v20 }
0x17c3   :  { %v1452_v53 = vpop.permute.xlu0 %1451  ;;  %v563_v13 = vmul.f32 1.442695, %v562_v47  ;;  %v1229_v20 = vmul.f32 1.442695, %v1228_v32 }
0x17c4   :  { %3130 = vpow2.f32 %v1018_v51  ;;  %v1236_v56 = vmul.f32 1.442695, %v1235_v52  ;;  %v1454_v58 = vsub.f32 %v3762_v59, %v1452_v53  ;;  %v351_v18 = vmul.f32 1.442695, %v350_v8 }
0x17c5   :  { %v1676_v6 = vpop.permute.xlu1 %1675  ;;  %v1011_v51 = vmul.f32 1.442695, %v1010_v26 }
0x17c6   :  { %3132 = vpow2.f32 %v1236_v56  ;;  %v1455_v60 = vmul.f32 1.442695, %v1454_v58  ;;  %v1678_v50 = vsub.f32 %v3780_v54, %v1676_v6 }
0x17c8   :  { %3134 = vpow2.f32 %v1455_v60  ;;  %v1679_v40 = vmul.f32 1.442695, %v1678_v50 }
0x17ca   :  { %v3127_v0 = vpop.eup %3126  ;;  %3136 = vpow2.f32 %v1679_v40 }
0x17cb   :  { %v572_v15 = vmul.f32 %v3127_v0, %v3731_v42  ;;  %3138 = vpow2.f32 %v351_v18  ;;  %v3284_v0 = vmov 7   ;;  %v1896_v18 = vmul.f32 1.442695, %v1895_v24 }
0x17cc   :  { %v3129_v30 = vpop.eup %3128  ;;  %3140 = vpow2.f32 %v787_v29 }
0x17cd   :  { %575 = vrot.lane.b32.xlu1 %v572_v15, %s3270_s24  ;;  %v796_v2 = vmul.f32 %v3129_v30, %v3731_v42  ;;  %3142 = vpow2.f32 %v354_v46 }
0x17ce   :  { %v3131_v3 = vpop.eup %3130 }
0x17cf   :  { %799 = vrot.lane.b32.xlu0 %v796_v2, %s3267_s4  ;;  %v1020_v59 = vmul.f32 %v3131_v3, %v3731_v42 }
0x17d0   :  { %v3133_v1 = vpop.eup %3132 }
0x17d1   :  { %1023 = vrot.lane.b32.xlu1 %v1020_v59, %s3268_s5  ;;  %v3851_v17 = vmul.f32 %v3133_v1, %v3731_v42 }
0x17d2   :  { %v3135_v54 = vpop.eup %3134 }
0x17d3   :  { %586 = vperm.xlu0 %3052, %v572_v15   ;;  %v1457_v27 = vmul.f32 %v3135_v54, %v3731_v42  ;;  %v1671_v15 = vsub.f32 %v3824_v33, %v3828_v37 }
0x17d4   :  { %v3137_v31 = vpop.eup %3136 }
0x17d5   :  { %1241 = vrot.lane.b32.xlu1 %v3851_v17, %s3271_s3  ;;  %v1681_v34 = vmul.f32 %v3137_v31, %v3731_v42  ;;  %v3139_v10 = vpop.eup %3138 }
0x17d6   :  { %v3141_v44 = vpop.eup %3140  ;;  %v357_v5 = vmul.f32 0.0, %v3139_v10 }
0x17d7   :  { %1460 = vrot.lane.b32.xlu0 %v1457_v27, %s3269_s2  ;;  %v3143_v57 = vpop.eup %3142 }
0x17d8   :  { %3055 = vset.pattern.permute.xlu0 %v3281_v36  ;;  %v356_v52 = vmul.f32 %v3143_v57, %v3731_v42 }
0x17d9   :  { %810 = vperm.xlu1 %3053, %v796_v2  }
0x17da   :  { %v358_v21 = vadd.f32 %v357_v5, %v356_v52 }
0x17db   :  { %1684 = vrot.lane.b32.xlu0 %v1681_v34, %s3272_s25 }
0x17dd   :  { %3054 = vset.pattern.permute.xlu1 %v3265_v14 }
0x17de   :  { %1034 = vperm.xlu1 %3054, %v1020_v59   ;;  %v1672_v59 = vmul.f32 1.442695, %v1671_v15 }
0x17df   :  { %1471 = vperm.xlu0 %3055, %v1457_v27  }
0x17e2   :  { %3056 = vset.pattern.permute.xlu1 %v3282_v16 }
0x17e3   :  { %3058 = vset.pattern.permute.xlu0 %v3263_v12 }
0x17e4   :  { %361 = vperm.xlu0 %3058, %v3139_v10  }
0x17e8   :  { %805 = vperm.xlu0 %3058, %v3141_v44  }
0x17ec   :  { %3060 = vset.pattern.permute.xlu0 %v3283_v45 }
0x182b   :  { %v1900_v14 = vpop.permute.xlu0 %1899 }
0x182c   :  { %v1902_v48 = vsub.f32 %v3793_v11, %v1900_v14 }
0x182e   :  { %v1903_v19 = vmul.f32 1.442695, %v1902_v48 }
0x1830   :  { %3144 = vpow2.f32 %v1903_v19 }
0x1831   :  { %3146 = vpow2.f32 %v563_v13 }
0x1832   :  { %3148 = vpow2.f32 %v1011_v51  ;;  %v1975_v51 = vld [vmem:[%s4073_s11 + $0x8] sm:$0xff] }
0x1833   :  { %3150 = vpow2.f32 %v1229_v20 }
0x1834   :  { %3152 = vpow2.f32 %v1448_v22 }
0x1835   :  { %3154 = vpow2.f32 %v1672_v59 }
0x1836   :  { %3156 = vpow2.f32 %v1896_v18 }
0x183a   :  { %v3145_v53 = vpop.eup %3144 }
0x183b   :  { %v3147_v56 = vpop.eup %3146  ;;  %v1905_v11 = vmul.f32 %v3145_v53, %v3731_v42 }
0x183c   :  { %v573_v58 = vmul.f32 %v3147_v56, %v358_v21  ;;  %v3149_v32 = vpop.eup %3148 }
0x183d   :  { %1908 = vrot.lane.b32.xlu1 %v1905_v11, %s3273_s26  ;;  %v3151_v3 = vpop.eup %3150 }
0x183e   :  { %v3153_v54 = vpop.eup %3152 }
0x183f   :  { %v576_v6 = vpop.permute.xlu1 %575  ;;  %v3155_v36 = vpop.eup %3154 }
0x1840   :  { %v578_v26 = vadd.f32 %v576_v6, %v573_v58  ;;  %v3157_v45 = vpop.eup %3156 }
0x1841   :  { %1695 = vperm.xlu1 %3056, %v1681_v34   ;;  %v800_v50 = vpop.permute.xlu0 %799 }
0x1842   :  { %v797_v60 = vmul.f32 %v3141_v44, %v578_v26 }
0x1843   :  { %v1024_v40 = vpop.permute.xlu1 %1023 }
0x1844   :  { %v802_v23 = vadd.f32 %v800_v50, %v797_v60 }
0x1845   :  { %3057 = vset.pattern.permute.xlu1 %v3284_v0 }
0x1846   :  { %v1021_v30 = vmul.f32 %v3149_v32, %v802_v23  ;;  %1919 = vperm.xlu1 %3057, %v1905_v11  }
0x1847   :  { %v1242_v1 = vpop.permute.xlu1 %1241 }
0x1848   :  { %v1026_v2 = vadd.f32 %v1024_v40, %v1021_v30 }
0x184a   :  { %v1239_v38 = vmul.f32 %v3151_v3, %v1026_v2  ;;  %3059 = vset.pattern.permute.xlu1 %v3263_v12 }
0x184b   :  { %367 = vperm.xlu1 %3059, %v356_v52   ;;  %v1976_v52 = vld [vmem:[%s4073_s11 + $0x10] sm:$0xff] }
0x184c   :  { %v1244_v8 = vadd.f32 %v1242_v1, %v1239_v38 }
0x184e   :  { %v1458_v27 = vmul.f32 %v3153_v54, %v1244_v8 }
0x184f   :  { %581 = vperm.xlu1 %3059, %v3147_v56  }
0x1852   :  { %v587_v33 = vpop.permute.xlu0 %586 }
0x1853   :  { %v590_v31 = vmul.f32 %v587_v33, %v3507_v39  ;;  %1029 = vperm.xlu1 %3059, %v3149_v32  }
0x1855   :  { %592 = vrot.lane.b32.xlu0 %v590_v31, %s3285_s19  ;;  %v2565_v31 = vld [vmem:[%s4074_s12] ss:$0 sm:$0xff] }
0x1856   :  { %v1461_v37 = vpop.permute.xlu0 %1460 }
0x1857   :  { %v1463_v43 = vadd.f32 %v1461_v37, %v1458_v27  ;;  %1247 = vperm.xlu1 %3059, %v3151_v3  }
0x1858   :  { %v811_v29 = vpop.permute.xlu1 %810 }
0x1859   :  { %v814_v34 = vmul.f32 %v811_v29, %v3534_v9  ;;  %1252 = vperm.xlu0 %3060, %v3851_v17   ;;  %v1682_v16 = vmul.f32 %v3155_v36, %v1463_v43 }
0x185a   :  { %v1685_v10 = vpop.permute.xlu0 %1684 }
0x185b   :  { %v1687_v44 = vadd.f32 %v1685_v10, %v1682_v16  ;;  %816 = vrot.lane.b32.xlu1 %v814_v34, %s3285_s19 }
0x185d   :  { %v1035_v39 = vpop.permute.xlu1 %1034  ;;  %3061 = vset.pattern.permute.xlu0 %v3263_v12  ;;  %v1906_v41 = vmul.f32 %v3157_v45, %v1687_v44 }
0x185e   :  { %v1038_v46 = vmul.f32 %v1035_v39, %v3568_v49  ;;  %v1472_v47 = vpop.permute.xlu0 %1471 }
0x185f   :  { %1466 = vperm.xlu1 %3059, %v3153_v54   ;;  %v1475_v9 = vmul.f32 %v1472_v47, %v3629_v61  ;;  %v1974_v61 = vld [vmem:[%s4073_s11] sm:$0xff] }
0x1860   :  { %1040 = vrot.lane.b32.xlu0 %v1038_v46, %s3285_s19  ;;  %v3944_v46 = vld [vmem:[%s4071_s9] ss:$0 sm:$0xff] }
0x1861   :  { %v1987_v47 = vmul.f32 0.0, %v3944_v46 }
0x1863   :  { %1690 = vperm.xlu1 %3059, %v3155_v36   ;;  %v362_v20 = vpop.permute.xlu0 %361 }
0x1864   :  { %1914 = vperm.xlu0 %3061, %v3157_v45   ;;  %v364_v21 = vmul.f32 0.0, %v362_v20 }
0x1867   :  { %1477 = vrot.lane.b32.xlu1 %v1475_v9, %s3285_s19  ;;  %v806_v22 = vpop.permute.xlu0 %805  ;;  %v3950_v9 = vld [vmem:[%s4072_s10] ss:$0 sm:$0xff] }
0x18af   :  { %v1909_v17 = vpop.permute.xlu1 %1908 }
0x18b0   :  { %v1911_v14 = vadd.f32 %v1909_v17, %v1906_v41  ;;  %v1994_v17 = vadd.f32 %v3950_v9, %v1987_v47 }
0x18b2   :  { %v1964_v48 = vmax.f32 %v1911_v14, 1e-20 }
0x18b4   :  { %3158 = vrcp.f32 %v1964_v48 }
0x18be   :  { %v3159_v13 = vpop.eup %3158 }
0x18bf   :  { %1968 = vperm.xlu1 %3059, %v3159_v13  }
0x18c0   :  { %v1696_v12 = vpop.permute.xlu1 %1695 }
0x18c1   :  { %v1699_v19 = vmul.f32 %v1696_v12, %v3659_v35  ;;  %v3909_v35 = vpack.c.bf16 %v1975_v51, %v1974_v61 }
0x18c3   :  { %1701 = vrot.lane.b32.xlu0 %v1699_v19, %s3285_s19  ;;  %2992 = vmatpush3.bf16.msra.mxu0 %v3909_v35 }
0x18c4   :  { %2998 = vmatpush3.bf16.msra.mxu1 %v3909_v35  ;;  %2993 = vmatprep.subr.bf16.mxu0 %v3258_v4 }
0x18c5   :  { %v1920_v49 = vpop.permute.xlu1 %1919  ;;  %2999 = vmatprep.subr.bf16.mxu1 %v3258_v4 }
0x18c6   :  { %v1923_v57 = vmul.f32 %v1920_v49, %v3718_v62  ;;  %v1977_v62 = vld [vmem:[%s4073_s11 + $0x18] sm:$0xff] }
0x18c7   :  { %v3915_v5 = vpack.c.bf16 %v1977_v62, %v1976_v52  ;;  %v593_v50 = vpop.permute.xlu0 %592  ;;  %v2566_v62 = vld [vmem:[%s4075_s13] ss:$0 sm:$0xff]  ;;  %s3286_s13 = smov [#allocation5]  }
0x18c8   :  { %1925 = vrot.lane.b32.xlu1 %v1923_v57, %s3285_s19 }
0x18c9   :  { %2995 = vmatpush3.bf16.msra.mxu0 %v3915_v5  ;;  %3001 = vmatpush3.bf16.msra.mxu1 %v3915_v5 }
0x18ca   :  { %3002 = vmatprep.subr.bf16.mxu0 %v3258_v4  ;;  %3008 = vmatprep.subr.bf16.mxu1 %v3258_v4  ;;  %v368_v53 = vpop.permute.xlu1 %367 }
0x18cb   :  { %v370_v11 = vmul.f32 %v368_v53, %v3479_v63 }
0x18cc   :  { %2082 = vrot.lane.b32.xlu1 %v2565_v31, %s3262_s23 }
0x18cd   :  { %v371_v6 = vadd.f32 %v370_v11, %v364_v21 }
0x18ce   :  { %v582_v56 = vpop.permute.xlu1 %581 }
0x18cf   :  { %v584_v26 = vmul.f32 %v582_v56, %v371_v6 }
0x18d1   :  { %v595_v23 = vadd.f32 %v593_v50, %v584_v26  ;;  %v3971_v50 = vld [vmem:[#allocation2] ss:$0 sm:$0xff] }
0x18d2   :  { %v1030_v58 = vpop.permute.xlu1 %1029 }
0x18d3   :  { %v808_v40 = vmul.f32 %v806_v22, %v595_v23 }
0x18d6   :  { %v1248_v60 = vpop.permute.xlu1 %1247 }
0x18d8   :  { %v1253_v15 = vpop.permute.xlu0 %1252 }
0x18d9   :  { %v1255_v38 = vmul.f32 %v1253_v15, %v3601_v28 }
0x18da   :  { %v817_v32 = vpop.permute.xlu1 %816 }
0x18db   :  { %v819_v0 = vadd.f32 %v817_v32, %v808_v40 }
0x18dc   :  { %v1041_v2 = vpop.permute.xlu0 %1040 }
0x18dd   :  { %v1032_v30 = vmul.f32 %v1030_v58, %v819_v0 }
0x18de   :  { %v1467_v59 = vpop.permute.xlu1 %1466 }
0x18df   :  { %v1043_v3 = vadd.f32 %v1041_v2, %v1032_v30 }
0x18e1   :  { %v1250_v24 = vmul.f32 %v1248_v60, %v1043_v3 }
0x18e2   :  { %v1691_v63 = vpop.permute.xlu1 %1690 }
0x18e3   :  { %v1256_v1 = vadd.f32 %v1255_v38, %v1250_v24  ;;  %v1915_v18 = vpop.permute.xlu0 %1914 }
0x18e5   :  { %v1469_v8 = vmul.f32 %v1467_v59, %v1256_v1 }
0x18e6   :  { %v1478_v54 = vpop.permute.xlu1 %1477 }
0x18e7   :  { %v1480_v27 = vadd.f32 %v1478_v54, %v1469_v8 }
0x18e9   :  { %v1693_v37 = vmul.f32 %v1691_v63, %v1480_v27 }
0x1935   :  { %v1702_v33 = vpop.permute.xlu0 %1701 }
0x1936   :  { %v1704_v43 = vadd.f32 %v1702_v33, %v1693_v37 }
0x1938   :  { %v1917_v29 = vmul.f32 %v1915_v18, %v1704_v43 }
0x193e   :  { %v1969_v36 = vpop.permute.xlu1 %1968 }
0x1942   :  { %v1926_v34 = vpop.permute.xlu1 %1925 }
0x1943   :  { %v1928_v16 = vadd.f32 %v1926_v34, %v1917_v29 }
0x1945   :  { %v1971_v28 = vmul.f32 %v1969_v36, %v1928_v16 }
0x1946   :  { %v3937_v44 = vpop.permute.xlu1 %2082 }
0x1947   :  { %1996 = vrot.lane.b32.xlu0 %v1971_v28, %s3266_s14 }
0x19b9   :  { %v1997_v10 = vpop.permute.xlu0 %1996 }
0x19ba   :  { %2859 = vmatmul.mubr.msk.f32.vlgmr.msra.gmra.mrb[16].mxu0 %vm145_vm1, %v1997_v10 }
0x19bb   :  { %3004 = vmatpush3.bf16.msra.mxu0 %v3909_v35  ;;  %2880 = vmatprep.mubr.msk.f32.mxu0 %vm3259_vm0, %v3260_v7 }
0x19bc   :  { %3005 = vmatprep.subr.bf16.mxu0 %v3258_v4 }
0x19bf   :  { %3007 = vmatpush3.bf16.msra.mxu0 %v3915_v5 }
0x1a8d   :  { %v2066_v45 = vpop.f32.mrb[16].mxu0 }
0x1a8e   :  { %v2085_v39 = vadd.f32 %v3937_v44, %v2066_v45  ;;  %v2860_v41 = vpop.f32.mrb[17].mxu0  ;;  %v2070_v14 = vadd.f32 %v2066_v45, %v1994_v17 }
0x1a90   :  { %2087 = vrot.lane.b32.xlu0 %v2085_v39, %s3262_s23  ;;  %v2564_v48 = vmul.f32 -1.442695, %v2070_v14 }
0x1a92   :  { %3160 = vpow2.f32 %v2564_v48 }
0x1a9c   :  { %v3161_v13 = vpop.eup %3160 }
0x1a9d   :  { %v2074_v12 = vadd.f32 1.0, %v3161_v13 }
0x1a9f   :  { %3162 = vrcp.f32 %v2074_v12 }
0x1aa9   :  { %v3163_v19 = vpop.eup %3162 }
0x1aaa   :  { %v2097_v53 = vsub.f32 1.0, %v3163_v19  ;;  %v2103_v20 = vmul.f32 %v3163_v19, %v1971_v28 }
0x1b02   :  { %v2088_v49 = vpop.permute.xlu0 %2087 }
0x1b03   :  { %v2090_v57 = vmul.f32 %v3163_v19, %v2088_v49 }
0x1b05   :  { %2092 = vrot.lane.b32.xlu1 %v2090_v57, %s3262_s23 }
0x1b77   :  { %v2093_v61 = vpop.permute.xlu1 %2092 }
0x1b78   :  { %v2095_v51 = vadd.f32 %v2093_v61, %v1994_v17 }
0x1b7a   :  { %3164 = vtanh.f32 %v2095_v51 }
0x1b84   :  { %v3165_v52 = vpop.eup %3164 }
0x1b85   :  { %2099 = vrot.lane.b32.xlu0 %v3165_v52, %s3266_s14 }
0x1b89   :  { %2110 = vrot.lane.b32.xlu0 %v2566_v62, %s3285_s19 }
0x1bf7   :  { %v2100_v56 = vpop.permute.xlu0 %2099 }
0x1bf8   :  { %v2102_v11 = vmul.f32 %v2100_v56, %v2097_v53 }
0x1bfa   :  { %v2104_v21 = vadd.f32 %v2103_v20, %v2102_v11 }
0x1bfb   :  { %v3959_v58 = vpop.permute.xlu0 %2110 }
0x1bfc   :  { %2136 = vrot.lane.b32.xlu1 %v2104_v21, %s3266_s14  ;;  %v2113_v6 = vmul.f32 %v3959_v58, %v2104_v21 }
0x1c00   :  { %2115 = vrot.lane.b32.xlu1 %v2113_v6, %s3266_s14 }
0x1c6e   :  { %v2137_v22 = vpop.permute.xlu1 %2136 }
0x1c6f   :  { %2870 = vmatmul.mubr.msk.f32.vlgmr.msra.gmra.mrb[16].mxu1 %vm145_vm1, %v2137_v22 }
0x1c70   :  { %3010 = vmatpush3.bf16.msra.mxu1 %v3909_v35  ;;  %2891 = vmatprep.mubr.msk.f32.mxu1 %vm3259_vm0, %v3260_v7 }
0x1c71   :  { %3011 = vmatprep.subr.bf16.mxu1 %v3258_v4 }
0x1c72   :  { %v2116_v26 = vpop.permute.xlu1 %2115 }
0x1c73   :  { %v2118_v60 = vsel %vm343_vm2, %v2116_v26, 0.0 }
0x1c74   :  { %2119 = vadd.xlane.f32.xlu0 %v2118_v60  ;;  %3013 = vmatpush3.bf16.msra.mxu1 %v3915_v5 }
0x1d01   :  { %v2120_v23 = vpop.xlane.xlu0 %2119 }
0x1d02   :  { %v2127_v32 = vadd.f32 %v3971_v50, %v2120_v23 }
0x1d04   :  { %2130 = vperm.xlu1 %3059, %v2127_v32  }
0x1d42   :  { %v2206_v40 = vpop.f32.mrb[16].mxu1 }
0x1d43   :  { %v2217_v35 = vadd.f32 %v2206_v40, %v3937_v44  ;;  %v2871_v0 = vpop.f32.mrb[17].mxu1 }
0x1d45   :  { %2219 = vrot.lane.b32.xlu1 %v2217_v35, %s3262_s23 }
0x1d83   :  { %v2131_v7 = vpop.permute.xlu1 %2130 }
0x1d84   :  { %v2133_v4 = vmul.f32 %v3944_v46, %v2131_v7  ;;  %v2482_v39 = vsel %vm1931_vm3, %v2131_v7, 0.0 }
0x1d86   :  { %v2134_v15 = vadd.f32 %v3950_v9, %v2133_v4 }
0x1d88   :  { %v2210_v30 = vadd.f32 %v2206_v40, %v2134_v15 }
0x1d8a   :  { %v2569_v2 = vmul.f32 -1.442695, %v2210_v30 }
0x1d8c   :  { %3166 = vpow2.f32 %v2569_v2 }
0x1d96   :  { %v3167_v5 = vpop.eup %3166 }
0x1d97   :  { %v2214_v3 = vadd.f32 1.0, %v3167_v5 }
0x1d99   :  { %3168 = vrcp.f32 %v2214_v3 }
0x1da3   :  { %v3169_v59 = vpop.eup %3168 }
0x1da4   :  { %v2229_v54 = vsub.f32 1.0, %v3169_v59  ;;  %v2235_v27 = vmul.f32 %v3169_v59, %v2104_v21 }
0x1db7   :  { %v2220_v24 = vpop.permute.xlu1 %2219 }
0x1db8   :  { %v2222_v38 = vmul.f32 %v3169_v59, %v2220_v24 }
0x1dba   :  { %2224 = vrot.lane.b32.xlu1 %v2222_v38, %s3262_s23 }
0x1e2c   :  { %v2225_v63 = vpop.permute.xlu1 %2224 }
0x1e2d   :  { %v2227_v1 = vadd.f32 %v2225_v63, %v2134_v15 }
0x1e2f   :  { %3170 = vtanh.f32 %v2227_v1 }
0x1e39   :  { %v3171_v8 = vpop.eup %3170 }
0x1e3a   :  { %2231 = vrot.lane.b32.xlu1 %v3171_v8, %s3266_s14 }
0x1eac   :  { %v2232_v18 = vpop.permute.xlu1 %2231 }
0x1ead   :  { %v2234_v33 = vmul.f32 %v2232_v18, %v2229_v54 }
0x1eaf   :  { %v2236_v31 = vadd.f32 %v2235_v27, %v2234_v33 }
0x1eb1   :  { %2254 = vrot.lane.b32.xlu1 %v2236_v31, %s3266_s14  ;;  %v2237_v37 = vmul.f32 %v2236_v31, %v3959_v58 }
0x1eb5   :  { %2239 = vrot.lane.b32.xlu1 %v2237_v37, %s3266_s14 }
0x1f23   :  { %v2255_v43 = vpop.permute.xlu1 %2254 }
0x1f24   :  { %2881 = vmatmul.mubr.msk.f32.vlgmr.msra.gmra.mrb[18].mxu0 %vm145_vm1, %v2255_v43 }
0x1f27   :  { %v2240_v36 = vpop.permute.xlu1 %2239 }
0x1f28   :  { %v2242_v29 = vsel %vm343_vm2, %v2240_v36, 0.0 }
0x1f29   :  { %2243 = vadd.xlane.f32.xlu1 %v2242_v29 }
0x1fb6   :  { %v2244_v34 = vpop.xlane.xlu1 %2243 }
0x1fb7   :  { %v2245_v16 = vadd.f32 %v3971_v50, %v2244_v34 }
0x1fb9   :  { %2248 = vperm.xlu0 %3061, %v2245_v16  }
0x1ff7   :  { %v2324_v28 = vpop.f32.mrb[18].mxu0 }
0x1ff8   :  { %v2335_v10 = vadd.f32 %v2324_v28, %v3937_v44  ;;  %v2882_v45 = vpop.f32.mrb[19].mxu0 }
0x1ffa   :  { %2337 = vrot.lane.b32.xlu0 %v2335_v10, %s3262_s23 }
0x2038   :  { %v2249_v41 = vpop.permute.xlu0 %2248 }
0x2039   :  { %v2483_v47 = vsel %vm1933_vm4, %v2249_v41, %v2482_v39  ;;  %v2251_v17 = vmul.f32 %v3944_v46, %v2249_v41 }
0x203b   :  { %v2252_v14 = vadd.f32 %v3950_v9, %v2251_v17 }
0x203d   :  { %v2328_v48 = vadd.f32 %v2324_v28, %v2252_v14 }
0x203f   :  { %v2571_v13 = vmul.f32 -1.442695, %v2328_v48 }
0x2041   :  { %3172 = vpow2.f32 %v2571_v13 }
0x204b   :  { %v3173_v12 = vpop.eup %3172 }
0x204c   :  { %v2332_v19 = vadd.f32 1.0, %v3173_v12 }
0x204e   :  { %3174 = vrcp.f32 %v2332_v19 }
0x2058   :  { %v3175_v49 = vpop.eup %3174 }
0x2059   :  { %v2347_v53 = vsub.f32 1.0, %v3175_v49  ;;  %v2353_v20 = vmul.f32 %v3175_v49, %v2236_v31 }
0x206c   :  { %v2338_v57 = vpop.permute.xlu0 %2337 }
0x206d   :  { %v2340_v61 = vmul.f32 %v3175_v49, %v2338_v57 }
0x206f   :  { %2342 = vrot.lane.b32.xlu0 %v2340_v61, %s3262_s23 }
0x20e1   :  { %v2343_v51 = vpop.permute.xlu0 %2342 }
0x20e2   :  { %v2345_v52 = vadd.f32 %v2343_v51, %v2252_v14 }
0x20e4   :  { %3176 = vtanh.f32 %v2345_v52 }
0x20ee   :  { %v3177_v62 = vpop.eup %3176 }
0x20ef   :  { %2349 = vrot.lane.b32.xlu1 %v3177_v62, %s3266_s14 }
0x2161   :  { %v2350_v56 = vpop.permute.xlu1 %2349 }
0x2162   :  { %v2352_v11 = vmul.f32 %v2350_v56, %v2347_v53 }
0x2164   :  { %v2354_v21 = vadd.f32 %v2353_v20, %v2352_v11 }
0x2166   :  { %2372 = vrot.lane.b32.xlu0 %v2354_v21, %s3266_s14  ;;  %v2355_v6 = vmul.f32 %v2354_v21, %v3959_v58 }
0x216a   :  { %2357 = vrot.lane.b32.xlu0 %v2355_v6, %s3266_s14 }
0x21d8   :  { %v2373_v22 = vpop.permute.xlu0 %2372 }
0x21d9   :  { %2892 = vmatmul.mubr.msk.f32.vlgmr.msra.gmra.mrb[18].mxu1 %vm145_vm1, %v2373_v22 }
0x21dc   :  { %v2358_v26 = vpop.permute.xlu0 %2357 }
0x21dd   :  { %v2360_v60 = vsel %vm343_vm2, %v2358_v26, 0.0 }
0x21de   :  { %2361 = vadd.xlane.f32.xlu0 %v2360_v60 }
0x226b   :  { %v2362_v23 = vpop.xlane.xlu0 %2361 }
0x226c   :  { %v2363_v32 = vadd.f32 %v3971_v50, %v2362_v23 }
0x226e   :  { %2366 = vperm.xlu1 %3059, %v2363_v32  }
0x22ac   :  { %v2442_v40 = vpop.f32.mrb[18].mxu1 }
0x22ad   :  { %v2453_v35 = vadd.f32 %v2442_v40, %v3937_v44  ;;  %v2893_v0 = vpop.f32.mrb[19].mxu1 }
0x22af   :  { %2455 = vrot.lane.b32.xlu1 %v2453_v35, %s3262_s23 }
0x22ed   :  { %v2367_v7 = vpop.permute.xlu1 %2366 }
0x22ee   :  { %v4006_v4 = vsel %vm1935_vm5, %v2367_v7, %v2483_v47  ;;  %v2369_v15 = vmul.f32 %v3944_v46, %v2367_v7  ;;  %v1949_v46 = vsel %vm347_vm6, %v3789_v25, -1e+30 }
0x22f0   :  { %v2370_v30 = vadd.f32 %v3950_v9, %v2369_v15  ;;  %v1950_v9 = vsel %vm1947_vm12, %v1949_v46, -inf }
0x22f2   :  { %v2446_v2 = vadd.f32 %v2442_v40, %v2370_v30 }
0x22f4   :  { %v2573_v5 = vmul.f32 -1.442695, %v2446_v2 }
0x22f6   :  { %3178 = vpow2.f32 %v2573_v5 }
0x2300   :  { %v3179_v3 = vpop.eup %3178 }
0x2301   :  { %v2450_v59 = vadd.f32 1.0, %v3179_v3 }
0x2303   :  { %3180 = vrcp.f32 %v2450_v59 }
0x230d   :  { %v3181_v24 = vpop.eup %3180 }
0x230e   :  { %v2465_v36 = vsub.f32 1.0, %v3181_v24  ;;  %v2471_v34 = vmul.f32 %v3181_v24, %v2354_v21 }
0x2321   :  { %v2456_v44 = vpop.permute.xlu1 %2455 }
0x2322   :  { %v2458_v38 = vmul.f32 %v3181_v24, %v2456_v44 }
0x2324   :  { %2460 = vrot.lane.b32.xlu1 %v2458_v38, %s3262_s23  ;;  %s2509_s23 = sshll.u32 %s3286_s13, 4  ;;  %s2510_s23 = int_to_ptr.vmem [resolvable:$true] %s2509_s23 }
0x2325   :  { %s3188_s26 = scalar_lea.vmem %s2510_s23, 32  ;;  %p3193_p1 = scmp.lt.s32.totalorder %s2510_s23, %s2510_s23 }
0x2326   :  { %p3189_p0 = scmp.ne.s32.totalorder %s2510_s23, %s3188_s26  ;;  %p3194_p2 = scmp.lt.s32.totalorder %s3188_s26, %s3188_s26 }
0x2328   :  { %p3195_p3 = por %p3194_p2, %p3193_p1 }
0x232a   :  { %p3196_p4 = pnand %p3195_p3, %p3189_p0 }
0x2396   :  { %v2461_v63 = vpop.permute.xlu1 %2460 }
0x2397   :  { %v2463_v1 = vadd.f32 %v2461_v63, %v2370_v30 }
0x2399   :  { %3182 = vtanh.f32 %v2463_v1 }
0x23a3   :  { %v3183_v8 = vpop.eup %3182 }
0x23a4   :  { %2467 = vrot.lane.b32.xlu1 %v3183_v8, %s3266_s14 }
0x23c8   :  { %1951 = vmax.xlane.f32.xlu1 %v1950_v9 }
0x2416   :  { %v2468_v54 = vpop.permute.xlu1 %2467 }
0x2417   :  { %v2470_v29 = vmul.f32 %v2468_v54, %v2465_v36 }
0x2419   :  { %v2472_v16 = vadd.f32 %v2471_v34, %v2470_v29 }
0x241b   :  { %v2473_v25 = vmul.f32 %v2472_v16, %v3959_v58 }
0x2455   :  { %v1952_v18 = vpop.xlane.xlu1 %1951 }
0x2456   :  { %v1953_v27 = vsub.f32 %v1949_v46, %v1952_v18 }
0x2458   :  { %v1954_v33 = vmul.f32 1.442695, %v1953_v27 }
0x245a   :  { %3184 = vpow2.f32 %v1954_v33 }
0x2464   :  { %v3185_v31 = vpop.eup %3184 }
0x2465   :  { %v1956_v37 = vmul.f32 %v3185_v31, %v3731_v42 }
0x2467   :  { %v1957_v43 = vsel %vm1947_vm12, %v1956_v37, 0.0 }
0x2468   :  { %1958 = vadd.xlane.f32.xlu0 %v1957_v43 }
0x247e   :  { %2475 = vrot.lane.b32.xlu0 %v2473_v25, %s3266_s14 }
0x24f5   :  { %v1959_v28 = vpop.xlane.xlu0 %1958 }
0x24f6   :  { %v1960_v10 = vmax.f32 %v1959_v28, 1e-20 }
0x24f8   :  { %3186 = vrcp.f32 %v1960_v10 }
0x24f9   :  { %v2476_v45 = vpop.permute.xlu0 %2475 }
0x24fa   :  { %v2478_v39 = vsel %vm343_vm2, %v2476_v45, 0.0 }
0x24fb   :  { %2479 = vadd.xlane.f32.xlu0 %v2478_v39 }
0x2502   :  { %v3187_v41 = vpop.eup %3186 }
0x2503   :  { %v1962_v42 = vmul.f32 %v3187_v41, %v1956_v37 }
0x2505   :  { %1963 = vst.msk [vmem:[#allocation7] sm:$0x3] %vm1947_vm12, %v1962_v42 }
0x2588   :  { %v2480_v47 = vpop.xlane.xlu0 %2479 }
0x2589   :  { %v2481_v17 = vadd.f32 %v3971_v50, %v2480_v47 }
0x258b   :  { %2487 = vperm.xlu1 %3059, %v2481_v17  }
0x258c   :  { %3199 = shalt.err (!%p3196_p4)
}
0x258d   :  { %s3200_s28 = scalar_lea.hbm %s4078_s16, 32 }
0x258e   :  { %p3201_p5 = scmp.ne.s32.totalorder %s4078_s16, %s3200_s28  ;;  %p3204_p6 = scmp.lt.u32.totalorder %s3200_s28, %s4078_s16 }
0x2590   :  { %p3206_p7 = pnand %p3204_p6, %p3201_p5 }
0x2592   :  { %3209 = shalt.err (!%p3206_p7)
}
0x2593   :  { %2512 = dma.vmem_to_hbm [thread:$0]  %s2510_s23, 32, %s4078_s16, [#allocation6]  }
0x2594   :  { %s3287_s1 = smov [#allocation7]  }
0x2595   :  { %s2519_s20 = sshll.u32 %s3287_s1, 4  ;;  %s2520_s20 = int_to_ptr.vmem [resolvable:$true] %s2519_s20 }
0x2596   :  { %s3210_s21 = scalar_lea.vmem %s2520_s20, 32  ;;  %p3215_p9 = scmp.lt.s32.totalorder %s2520_s20, %s2520_s20 }
0x2597   :  { %p3211_p8 = scmp.ne.s32.totalorder %s2520_s20, %s3210_s21  ;;  %p3216_p10 = scmp.lt.s32.totalorder %s3210_s21, %s3210_s21 }
0x2599   :  { %p3217_p11 = por %p3216_p10, %p3215_p9 }
0x259b   :  { %p3218_p12 = pnand %p3217_p11, %p3211_p8 }
0x259d   :  { %3221 = shalt.err (!%p3218_p12)
}
0x259e   :  { %s3222_s22 = scalar_lea.hbm %s4079_s17, 32 }
0x259f   :  { %p3223_p13 = scmp.ne.s32.totalorder %s4079_s17, %s3222_s22  ;;  %p3226_p0 = scmp.lt.u32.totalorder %s3222_s22, %s4079_s17 }
0x25a1   :  { %p3228_p1 = pnand %p3226_p0, %p3223_p13 }
0x25a3   :  { %3231 = shalt.err (!%p3228_p1)
}
0x25a4   :  { %2522 = dma.vmem_to_hbm [thread:$0]  %s2520_s20, 32, %s4079_s17, [#allocation6]   ;;  %vm2491_vm13 = vcmask 25600  }
0x25a5   :  { %s3288_s24 = smov [#allocation3]  }
0x25a6   :  { %s2499_s3 = sshll.u32 %s3288_s24, 4  ;;  %s2500_s3 = int_to_ptr.vmem [resolvable:$true] %s2499_s3 }
0x25a7   :  { %s3232_s25 = scalar_lea.vmem %s2500_s3, 32  ;;  %p3237_p3 = scmp.lt.s32.totalorder %s2500_s3, %s2500_s3 }
0x25a8   :  { %p3233_p2 = scmp.ne.s32.totalorder %s2500_s3, %s3232_s25  ;;  %p3238_p4 = scmp.lt.s32.totalorder %s3232_s25, %s3232_s25 }
0x25aa   :  { %p3239_p5 = por %p3238_p4, %p3237_p3 }
0x25ac   :  { %p3240_p6 = pnand %p3239_p5, %p3233_p2 }
0x260a   :  { %v2488_v58 = vpop.permute.xlu1 %2487 }
0x260b   :  { %v2490_v50 = vsel %vm1937_vm7, %v2488_v58, %v4006_v4 }
0x260c   :  { %2492 = vst.msk [vmem:[#allocation3] sm:$0x3] %vm2491_vm13, %v2490_v50 }
0x260d   :  { %3243 = shalt.err (!%p3240_p6)
}
0x260e   :  { %s3244_s17 = scalar_lea.hbm %s4077_s15, 32 }
0x260f   :  { %p3245_p7 = scmp.ne.s32.totalorder %s4077_s15, %s3244_s17  ;;  %p3248_p8 = scmp.lt.u32.totalorder %s3244_s17, %s4077_s15 }
0x2611   :  { %p3250_p9 = pnand %p3248_p8, %p3245_p7 }
0x2613   :  { %3253 = shalt.err (!%p3250_p9)
}
0x2614   :  { %2502 = dma.vmem_to_hbm [thread:$0]  %s2500_s3, 32, %s4077_s15, [#allocation4]  }
0x2615   :  { %3254 = dma.done.wait [#allocation4], 32  }
0x2616   :  { %3255 = vsyncadd [#allocation4], 4294967264 }
0x2617   :  { %3256 = dma.done.wait [#allocation6], 64  }
0x2618   :  { %3257 = vsyncadd [#allocation6], 4294967232 }
0x2619   :  { %2532 = vsyncpa [#allocation4], 1 }
0x261a   :  { %2533 = vsyncpa [#allocation6], 1 }

</bundles_post_ra>
